<compile_context>
chip_gen: v5e
topology: v5e:2x2
jax: 0.10.0
libtpu: 0.0.40
codegen_flags: <defaults>
</compile_context>

<pallas_src>
import functools

import jax
import jax.numpy as jnp
from jax.experimental import pallas as pl
from jax.experimental.pallas import tpu as pltpu


# -----------------------------------------------------------------------------
# Kernel: entire 2-layer LSTM recurrence + fc head in one invocation.
# -----------------------------------------------------------------------------
def _lstm_kernel(x_ref, wih0_ref, whh0_ref, b0_ref,
                 w1_ref, b1_ref, wfc_ref, bfc_ref,
                 y_ref,
                 xz0_ref, hs_ref,
                 *, seq_len, batch_pad, hidden_size):
    H = hidden_size
    Bp = batch_pad

    # ---- hoist: layer-0 input projections for ALL time steps, one matmul.
    # (S*Bp, D) @ (D, 4H) + (1, 4H)  ->  VMEM scratch (S*Bp, 4H)
    xz0_ref[...] = (jnp.dot(x_ref[...], wih0_ref[...],
                            preferred_element_type=jnp.float32)
                    + b0_ref[...])

    # Loop-invariant weights / biases, loaded once into vregs.
    whh0 = whh0_ref[...]          # (H, 4H)
    w1 = w1_ref[...]              # (2H, 4H) = [W_ih1; W_hh1]^T stacked
    b1 = b1_ref[...]              # (1, 4H)

    # Lane mask: lanes [2H, 3H) are the 'g' gate (tanh); others i/f/o (sigmoid).
    lane = jax.lax.broadcasted_iota(jnp.int32, (Bp, 4 * H), 1)
    is_g = jnp.logical_and(lane >= 2 * H, lane < 3 * H)

    def gates(z):
        # One tanh over the whole (Bp, 4H) block:
        #   sigmoid(x) = 0.5 * tanh(0.5 * x) + 0.5    (i/f/o lanes)
        #   tanh(x)                                    (g lanes)
        zs = jnp.where(is_g, z, 0.5 * z)
        t = jnp.tanh(zs)
        act = jnp.where(is_g, t, 0.5 * t + 0.5)
        return (act[:, 0:H], act[:, H:2 * H],
                act[:, 2 * H:3 * H], act[:, 3 * H:4 * H])

    zeros = jnp.zeros((Bp, H), jnp.float32)

    def step(t, carry):
        h0, c0, h1, c1 = carry
        off = pl.multiple_of(t * Bp, Bp)

        # ---- layer 0: input projection precomputed; only the recurrent dot.
        z0 = (xz0_ref[pl.ds(off, Bp), :]
              + jnp.dot(h0, whh0, preferred_element_type=jnp.float32))
        i0, f0, g0, o0 = gates(z0)
        c0 = f0 * c0 + i0 * g0
        h0 = o0 * jnp.tanh(c0)

        # ---- layer 1: fused [h_l0 | h1] @ [W_ih1; W_hh1].
        z1 = (jnp.dot(jnp.concatenate([h0, h1], axis=-1), w1,
                      preferred_element_type=jnp.float32)
              + b1)
        i1, f1, g1, o1 = gates(z1)
        c1 = f1 * c1 + i1 * g1
        h1 = o1 * jnp.tanh(c1)

        # Stash this step's top-layer hidden state (lane-dense, width H).
        hs_ref[pl.ds(off, Bp), :] = h1
        return (h0, c0, h1, c1)

    jax.lax.fori_loop(0, seq_len, step, (zeros, zeros, zeros, zeros),
                      unroll=True)

    # ---- fc head once over the whole (S*Bp, H) hidden slab.
    y_ref[...] = (jnp.dot(hs_ref[...], wfc_ref[...],
                          preferred_element_type=jnp.float32)
                  + bfc_ref[...])


# -----------------------------------------------------------------------------
# Wrapper: pad batch to the sublane tile, single pallas_call, un-pad output.
# -----------------------------------------------------------------------------
def lstm_regression_forward(x, params):
    """x: (S, B, D) float32.  Returns (S, B, O) float32."""
    S, B, D = x.shape
    H = params["whh0_T"].shape[0]
    O = params["wfc_T"].shape[1]

    Bp = ((B + 7) // 8) * 8                      # pad batch to f32 sublane tile
    x_pad = jnp.pad(x, ((0, 0), (0, Bp - B), (0, 0)))
    x_flat = x_pad.reshape(S * Bp, D)

    kernel = functools.partial(
        _lstm_kernel, seq_len=S, batch_pad=Bp, hidden_size=H)

    vmem = pltpu.MemorySpace.VMEM
    y_flat = pl.pallas_call(
        kernel,
        out_shape=jax.ShapeDtypeStruct((S * Bp, O), jnp.float32),
        in_specs=[pl.BlockSpec(memory_space=vmem)] * 8,   # whole arrays, loaded once
        out_specs=pl.BlockSpec(memory_space=vmem),
        scratch_shapes=[
            pltpu.VMEM((S * Bp, 4 * H), jnp.float32),  # precomputed x@W_ih0 + b0
            pltpu.VMEM((S * Bp, H), jnp.float32),      # top-layer hidden slab
        ],
    )(x_flat,
      params["wih0_T"], params["whh0_T"], params["b0"],
      params["w1_T"], params["b1"],
      params["wfc_T"], params["bfc"])

    return y_flat.reshape(S, Bp, O)[:, :B, :]


# -----------------------------------------------------------------------------
# Deterministic parameter init (PyTorch nn.LSTM / nn.Linear shapes,
# U(-1/sqrt(H), 1/sqrt(H))).  Weights stored pre-transposed / pre-fused.
# -----------------------------------------------------------------------------
def init_params(key, input_size, hidden_size, output_size):
    H = hidden_size
    k = 1.0 / jnp.sqrt(jnp.float32(H))
    keys = jax.random.split(key, 10)
    u = lambda kk, shape: jax.random.uniform(kk, shape, jnp.float32, -k, k)

    w_ih0 = u(keys[0], (4 * H, input_size))
    w_hh0 = u(keys[1], (4 * H, H))
    b_ih0 = u(keys[2], (4 * H,))
    b_hh0 = u(keys[3], (4 * H,))
    w_ih1 = u(keys[4], (4 * H, H))
    w_hh1 = u(keys[5], (4 * H, H))
    b_ih1 = u(keys[6], (4 * H,))
    b_hh1 = u(keys[7], (4 * H,))
    w_fc = u(keys[8], (output_size, H))
    b_fc = u(keys[9], (output_size,))

    return {
        "wih0_T": w_ih0.T,                               # (D, 4H)
        "whh0_T": w_hh0.T,                               # (H, 4H)
        "b0": (b_ih0 + b_hh0).reshape(1, 4 * H),
        "w1_T": jnp.concatenate([w_ih1.T, w_hh1.T], 0),  # (2H, 4H) fused
        "b1": (b_ih1 + b_hh1).reshape(1, 4 * H),
        "wfc_T": w_fc.T,                                 # (H, O)
        "bfc": b_fc.reshape(1, output_size),             # (1, O)
    }


# -----------------------------------------------------------------------------
# Pure-JAX reference (same math) for correctness.
# -----------------------------------------------------------------------------
def ref_forward(x, p):
    S, B, D = x.shape
    H = p["whh0_T"].shape[0]

    def run_layer(xs, wih_t, whh_t, b):
        def step(carry, x_t):
            h, c = carry
            z = x_t @ wih_t + h @ whh_t + b
            i = jax.nn.sigmoid(z[:, 0:H])
            f = jax.nn.sigmoid(z[:, H:2 * H])
            g = jnp.tanh(z[:, 2 * H:3 * H])
            o = jax.nn.sigmoid(z[:, 3 * H:4 * H])
            c = f * c + i * g
            h = o * jnp.tanh(c)
            return (h, c), h
        init = (jnp.zeros((B, H), jnp.float32), jnp.zeros((B, H), jnp.float32))
        _, hs = jax.lax.scan(step, init, xs)
        return hs

    h1 = run_layer(x, p["wih0_T"], p["whh0_T"], p["b0"][0])
    h2 = run_layer(h1, p["w1_T"][:H], p["w1_T"][H:], p["b1"][0])
    return h2 @ p["wfc_T"] + p["bfc"][0]


if __name__ == "__main__":
    SEQ, BATCH, INPUT, HIDDEN, OUTPUT = 8, 2, 4, 32, 1

    key = jax.random.PRNGKey(0)
    k_x, k_p = jax.random.split(key)
    x = jax.random.normal(k_x, (SEQ, BATCH, INPUT), jnp.float32)
    params = init_params(k_p, INPUT, HIDDEN, OUTPUT)

    y = jax.block_until_ready(lstm_regression_forward(x, params))
    y_ref = jax.block_until_ready(ref_forward(x, params))

    assert y.shape == (SEQ, BATCH, OUTPUT)
    assert jnp.allclose(y, y_ref, atol=1e-2, rtol=1e-2), (y, y_ref)

    print("KERNEL_OK")
</pallas_src>

<mosaic_0001>
module attributes {stable_mosaic.version = 11 : i64} {
  func.func @_lstm_kernel(%arg0: memref<64x4xf32, #tpu.memory_space<vmem>>, %arg1: memref<4x128xf32, #tpu.memory_space<vmem>>, %arg2: memref<32x128xf32, #tpu.memory_space<vmem>>, %arg3: memref<1x128xf32, #tpu.memory_space<vmem>>, %arg4: memref<64x128xf32, #tpu.memory_space<vmem>>, %arg5: memref<1x128xf32, #tpu.memory_space<vmem>>, %arg6: memref<32x1xf32, #tpu.memory_space<vmem>>, %arg7: memref<1x1xf32, #tpu.memory_space<vmem>>, %arg8: memref<64x1xf32, #tpu.memory_space<vmem>>, %arg9: memref<64x128xf32, #tpu.memory_space<vmem>>, %arg10: memref<64x32xf32, #tpu.memory_space<vmem>>) attributes {dimension_semantics = [], scalar_prefetch = 0 : i64, scratch_operands = 2 : i64, tpu.core_type = #tpu.core_type<tc>} {
    %c0 = arith.constant 0 : index
    %c0_0 = arith.constant 0 : index
    %0 = vector.load %arg0[%c0, %c0_0] : memref<64x4xf32, #tpu.memory_space<vmem>>, vector<64x4xf32>
    %c0_1 = arith.constant 0 : index
    %c0_2 = arith.constant 0 : index
    %1 = vector.load %arg1[%c0_1, %c0_2] : memref<4x128xf32, #tpu.memory_space<vmem>>, vector<4x128xf32>
    %cst = arith.constant dense<0.000000e+00> : vector<64x128xf32>
    %2 = tpu.matmul %0, %1, %cst {dimension_numbers = #tpu.dot_dimension_numbers<[1], [0], [0], [1], [0, 0, 1, 1], [], []>} : vector<64x4xf32>, vector<4x128xf32>, vector<64x128xf32> -> vector<64x128xf32>
    %c0_3 = arith.constant 0 : index
    %c0_4 = arith.constant 0 : index
    %3 = vector.load %arg3[%c0_3, %c0_4] : memref<1x128xf32, #tpu.memory_space<vmem>>, vector<1x128xf32>
    %4 = vector.broadcast %3 : vector<1x128xf32> to vector<64x128xf32>
    %5 = arith.addf %2, %4 : vector<64x128xf32>
    %c0_5 = arith.constant 0 : index
    %c0_6 = arith.constant 0 : index
    %6 = vector.load %arg9[%c0_5, %c0_6] : memref<64x128xf32, #tpu.memory_space<vmem>>, vector<64x128xf32>
    tpu.vector_store %arg9[%c0_5, %c0_6], %5 {strides = array<i32>} : memref<64x128xf32, #tpu.memory_space<vmem>>, vector<64x128xf32>,
    %c0_7 = arith.constant 0 : index
    %c0_8 = arith.constant 0 : index
    %7 = vector.load %arg2[%c0_7, %c0_8] : memref<32x128xf32, #tpu.memory_space<vmem>>, vector<32x128xf32>
    %c0_9 = arith.constant 0 : index
    %c0_10 = arith.constant 0 : index
    %8 = vector.load %arg4[%c0_9, %c0_10] : memref<64x128xf32, #tpu.memory_space<vmem>>, vector<64x128xf32>
    %c0_11 = arith.constant 0 : index
    %c0_12 = arith.constant 0 : index
    %9 = vector.load %arg5[%c0_11, %c0_12] : memref<1x128xf32, #tpu.memory_space<vmem>>, vector<1x128xf32>
    %10 = tpu.iota {dimensions = array<i32: 1>} : vector<8x128xi32>
    %c64_i32 = arith.constant 64 : i32
    %11 = vector.broadcast %c64_i32 : i32 to vector<8x128xi32>
    %12 = arith.cmpi sge, %10, %11 : vector<8x128xi32>
    %c96_i32 = arith.constant 96 : i32
    %13 = vector.broadcast %c96_i32 : i32 to vector<8x128xi32>
    %14 = arith.cmpi slt, %10, %13 : vector<8x128xi32>
    %15 = arith.andi %12, %14 : vector<8x128xi1>
    %cst_13 = arith.constant 0.000000e+00 : f32
    %16 = vector.broadcast %cst_13 : f32 to vector<8x32xf32>
    %c0_i32 = arith.constant 0 : i32
    %c8_i32 = arith.constant 8 : i32
    %17 = arith.muli %c0_i32, %c8_i32 : i32
    %18 = tpu.assume_multiple %17, 8 : i32
    %19 = arith.index_cast %18 : i32 to index
    %c0_14 = arith.constant 0 : index
    %20 = vector.load %arg9[%19, %c0_14] : memref<64x128xf32, #tpu.memory_space<vmem>>, vector<8x128xf32>
    %cst_15 = arith.constant dense<0.000000e+00> : vector<8x128xf32>
    %21 = tpu.matmul %16, %7, %cst_15 {dimension_numbers = #tpu.dot_dimension_numbers<[1], [0], [0], [1], [0, 0, 1, 1], [], []>} : vector<8x32xf32>, vector<32x128xf32>, vector<8x128xf32> -> vector<8x128xf32>
    %22 = arith.addf %20, %21 : vector<8x128xf32>
    %cst_16 = arith.constant 5.000000e-01 : f32
    %23 = vector.broadcast %cst_16 : f32 to vector<8x128xf32>
    %24 = arith.mulf %23, %22 : vector<8x128xf32>
    %25 = arith.select %15, %22, %24 : vector<8x128xi1>, vector<8x128xf32>
    %26 = math.tanh %25 : vector<8x128xf32>
    %cst_17 = arith.constant 5.000000e-01 : f32
    %27 = vector.broadcast %cst_17 : f32 to vector<8x128xf32>
    %28 = arith.mulf %27, %26 : vector<8x128xf32>
    %cst_18 = arith.constant 5.000000e-01 : f32
    %29 = vector.broadcast %cst_18 : f32 to vector<8x128xf32>
    %30 = arith.addf %28, %29 : vector<8x128xf32>
    %31 = arith.select %15, %26, %30 : vector<8x128xi1>, vector<8x128xf32>
    %32 = vector.extract_strided_slice %31 {offsets = [0, 0], sizes = [8, 32], strides = [1, 1]} : vector<8x128xf32> to vector<8x32xf32>
    %33 = vector.extract_strided_slice %31 {offsets = [0, 32], sizes = [8, 32], strides = [1, 1]} : vector<8x128xf32> to vector<8x32xf32>
    %34 = vector.extract_strided_slice %31 {offsets = [0, 64], sizes = [8, 32], strides = [1, 1]} : vector<8x128xf32> to vector<8x32xf32>
    %35 = vector.extract_strided_slice %31 {offsets = [0, 96], sizes = [8, 32], strides = [1, 1]} : vector<8x128xf32> to vector<8x32xf32>
    %36 = arith.mulf %33, %16 : vector<8x32xf32>
    %37 = arith.mulf %32, %34 : vector<8x32xf32>
    %38 = arith.addf %36, %37 : vector<8x32xf32>
    %39 = math.tanh %38 : vector<8x32xf32>
    %40 = arith.mulf %35, %39 : vector<8x32xf32>
    %41 = tpu.concatenate %40, %16 in 1 : vector<8x32xf32>, vector<8x32xf32> -> vector<8x64xf32>
    %cst_19 = arith.constant dense<0.000000e+00> : vector<8x128xf32>
    %42 = tpu.matmul %41, %8, %cst_19 {dimension_numbers = #tpu.dot_dimension_numbers<[1], [0], [0], [1], [0, 0, 1, 1], [], []>} : vector<8x64xf32>, vector<64x128xf32>, vector<8x128xf32> -> vector<8x128xf32>
    %43 = vector.broadcast %9 : vector<1x128xf32> to vector<8x128xf32>
    %44 = arith.addf %42, %43 : vector<8x128xf32>
    %cst_20 = arith.constant 5.000000e-01 : f32
    %45 = vector.broadcast %cst_20 : f32 to vector<8x128xf32>
    %46 = arith.mulf %45, %44 : vector<8x128xf32>
    %47 = arith.select %15, %44, %46 : vector<8x128xi1>, vector<8x128xf32>
    %48 = math.tanh %47 : vector<8x128xf32>
    %cst_21 = arith.constant 5.000000e-01 : f32
    %49 = vector.broadcast %cst_21 : f32 to vector<8x128xf32>
    %50 = arith.mulf %49, %48 : vector<8x128xf32>
    %cst_22 = arith.constant 5.000000e-01 : f32
    %51 = vector.broadcast %cst_22 : f32 to vector<8x128xf32>
    %52 = arith.addf %50, %51 : vector<8x128xf32>
    %53 = arith.select %15, %48, %52 : vector<8x128xi1>, vector<8x128xf32>
    %54 = vector.extract_strided_slice %53 {offsets = [0, 0], sizes = [8, 32], strides = [1, 1]} : vector<8x128xf32> to vector<8x32xf32>
    %55 = vector.extract_strided_slice %53 {offsets = [0, 32], sizes = [8, 32], strides = [1, 1]} : vector<8x128xf32> to vector<8x32xf32>
    %56 = vector.extract_strided_slice %53 {offsets = [0, 64], sizes = [8, 32], strides = [1, 1]} : vector<8x128xf32> to vector<8x32xf32>
    %57 = vector.extract_strided_slice %53 {offsets = [0, 96], sizes = [8, 32], strides = [1, 1]} : vector<8x128xf32> to vector<8x32xf32>
    %58 = arith.mulf %55, %16 : vector<8x32xf32>
    %59 = arith.mulf %54, %56 : vector<8x32xf32>
    %60 = arith.addf %58, %59 : vector<8x32xf32>
    %61 = math.tanh %60 : vector<8x32xf32>
    %62 = arith.mulf %57, %61 : vector<8x32xf32>
    %63 = arith.index_cast %18 : i32 to index
    %c0_23 = arith.constant 0 : index
    %64 = vector.load %arg10[%63, %c0_23] : memref<64x32xf32, #tpu.memory_space<vmem>>, vector<8x32xf32>
    tpu.vector_store %arg10[%63, %c0_23], %62 {strides = array<i32>} : memref<64x32xf32, #tpu.memory_space<vmem>>, vector<8x32xf32>,
    %c1_i32 = arith.constant 1 : i32
    %c8_i32_24 = arith.constant 8 : i32
    %65 = arith.muli %c1_i32, %c8_i32_24 : i32
    %66 = tpu.assume_multiple %65, 8 : i32
    %67 = arith.index_cast %66 : i32 to index
    %c0_25 = arith.constant 0 : index
    %68 = vector.load %arg9[%67, %c0_25] : memref<64x128xf32, #tpu.memory_space<vmem>>, vector<8x128xf32>
    %cst_26 = arith.constant dense<0.000000e+00> : vector<8x128xf32>
    %69 = tpu.matmul %40, %7, %cst_26 {dimension_numbers = #tpu.dot_dimension_numbers<[1], [0], [0], [1], [0, 0, 1, 1], [], []>} : vector<8x32xf32>, vector<32x128xf32>, vector<8x128xf32> -> vector<8x128xf32>
    %70 = arith.addf %68, %69 : vector<8x128xf32>
    %cst_27 = arith.constant 5.000000e-01 : f32
    %71 = vector.broadcast %cst_27 : f32 to vector<8x128xf32>
    %72 = arith.mulf %71, %70 : vector<8x128xf32>
    %73 = arith.select %15, %70, %72 : vector<8x128xi1>, vector<8x128xf32>
    %74 = math.tanh %73 : vector<8x128xf32>
    %cst_28 = arith.constant 5.000000e-01 : f32
    %75 = vector.broadcast %cst_28 : f32 to vector<8x128xf32>
    %76 = arith.mulf %75, %74 : vector<8x128xf32>
    %cst_29 = arith.constant 5.000000e-01 : f32
    %77 = vector.broadcast %cst_29 : f32 to vector<8x128xf32>
    %78 = arith.addf %76, %77 : vector<8x128xf32>
    %79 = arith.select %15, %74, %78 : vector<8x128xi1>, vector<8x128xf32>
    %80 = vector.extract_strided_slice %79 {offsets = [0, 0], sizes = [8, 32], strides = [1, 1]} : vector<8x128xf32> to vector<8x32xf32>
    %81 = vector.extract_strided_slice %79 {offsets = [0, 32], sizes = [8, 32], strides = [1, 1]} : vector<8x128xf32> to vector<8x32xf32>
    %82 = vector.extract_strided_slice %79 {offsets = [0, 64], sizes = [8, 32], strides = [1, 1]} : vector<8x128xf32> to vector<8x32xf32>
    %83 = vector.extract_strided_slice %79 {offsets = [0, 96], sizes = [8, 32], strides = [1, 1]} : vector<8x128xf32> to vector<8x32xf32>
    %84 = arith.mulf %81, %38 : vector<8x32xf32>
    %85 = arith.mulf %80, %82 : vector<8x32xf32>
    %86 = arith.addf %84, %85 : vector<8x32xf32>
    %87 = math.tanh %86 : vector<8x32xf32>
    %88 = arith.mulf %83, %87 : vector<8x32xf32>
    %89 = tpu.concatenate %88, %62 in 1 : vector<8x32xf32>, vector<8x32xf32> -> vector<8x64xf32>
    %cst_30 = arith.constant dense<0.000000e+00> : vector<8x128xf32>
    %90 = tpu.matmul %89, %8, %cst_30 {dimension_numbers = #tpu.dot_dimension_numbers<[1], [0], [0], [1], [0, 0, 1, 1], [], []>} : vector<8x64xf32>, vector<64x128xf32>, vector<8x128xf32> -> vector<8x128xf32>
    %91 = vector.broadcast %9 : vector<1x128xf32> to vector<8x128xf32>
    %92 = arith.addf %90, %91 : vector<8x128xf32>
    %cst_31 = arith.constant 5.000000e-01 : f32
    %93 = vector.broadcast %cst_31 : f32 to vector<8x128xf32>
    %94 = arith.mulf %93, %92 : vector<8x128xf32>
    %95 = arith.select %15, %92, %94 : vector<8x128xi1>, vector<8x128xf32>
    %96 = math.tanh %95 : vector<8x128xf32>
    %cst_32 = arith.constant 5.000000e-01 : f32
    %97 = vector.broadcast %cst_32 : f32 to vector<8x128xf32>
    %98 = arith.mulf %97, %96 : vector<8x128xf32>
    %cst_33 = arith.constant 5.000000e-01 : f32
    %99 = vector.broadcast %cst_33 : f32 to vector<8x128xf32>
    %100 = arith.addf %98, %99 : vector<8x128xf32>
    %101 = arith.select %15, %96, %100 : vector<8x128xi1>, vector<8x128xf32>
    %102 = vector.extract_strided_slice %101 {offsets = [0, 0], sizes = [8, 32], strides = [1, 1]} : vector<8x128xf32> to vector<8x32xf32>
    %103 = vector.extract_strided_slice %101 {offsets = [0, 32], sizes = [8, 32], strides = [1, 1]} : vector<8x128xf32> to vector<8x32xf32>
    %104 = vector.extract_strided_slice %101 {offsets = [0, 64], sizes = [8, 32], strides = [1, 1]} : vector<8x128xf32> to vector<8x32xf32>
    %105 = vector.extract_strided_slice %101 {offsets = [0, 96], sizes = [8, 32], strides = [1, 1]} : vector<8x128xf32> to vector<8x32xf32>
    %106 = arith.mulf %103, %60 : vector<8x32xf32>
    %107 = arith.mulf %102, %104 : vector<8x32xf32>
    %108 = arith.addf %106, %107 : vector<8x32xf32>
    %109 = math.tanh %108 : vector<8x32xf32>
    %110 = arith.mulf %105, %109 : vector<8x32xf32>
    %111 = arith.index_cast %66 : i32 to index
    %c0_34 = arith.constant 0 : index
    %112 = vector.load %arg10[%111, %c0_34] : memref<64x32xf32, #tpu.memory_space<vmem>>, vector<8x32xf32>
    tpu.vector_store %arg10[%111, %c0_34], %110 {strides = array<i32>} : memref<64x32xf32, #tpu.memory_space<vmem>>, vector<8x32xf32>,
    %c2_i32 = arith.constant 2 : i32
    %c8_i32_35 = arith.constant 8 : i32
    %113 = arith.muli %c2_i32, %c8_i32_35 : i32
    %114 = tpu.assume_multiple %113, 8 : i32
    %115 = arith.index_cast %114 : i32 to index
    %c0_36 = arith.constant 0 : index
    %116 = vector.load %arg9[%115, %c0_36] : memref<64x128xf32, #tpu.memory_space<vmem>>, vector<8x128xf32>
    %cst_37 = arith.constant dense<0.000000e+00> : vector<8x128xf32>
    %117 = tpu.matmul %88, %7, %cst_37 {dimension_numbers = #tpu.dot_dimension_numbers<[1], [0], [0], [1], [0, 0, 1, 1], [], []>} : vector<8x32xf32>, vector<32x128xf32>, vector<8x128xf32> -> vector<8x128xf32>
    %118 = arith.addf %116, %117 : vector<8x128xf32>
    %cst_38 = arith.constant 5.000000e-01 : f32
    %119 = vector.broadcast %cst_38 : f32 to vector<8x128xf32>
    %120 = arith.mulf %119, %118 : vector<8x128xf32>
    %121 = arith.select %15, %118, %120 : vector<8x128xi1>, vector<8x128xf32>
    %122 = math.tanh %121 : vector<8x128xf32>
    %cst_39 = arith.constant 5.000000e-01 : f32
    %123 = vector.broadcast %cst_39 : f32 to vector<8x128xf32>
    %124 = arith.mulf %123, %122 : vector<8x128xf32>
    %cst_40 = arith.constant 5.000000e-01 : f32
    %125 = vector.broadcast %cst_40 : f32 to vector<8x128xf32>
    %126 = arith.addf %124, %125 : vector<8x128xf32>
    %127 = arith.select %15, %122, %126 : vector<8x128xi1>, vector<8x128xf32>
    %128 = vector.extract_strided_slice %127 {offsets = [0, 0], sizes = [8, 32], strides = [1, 1]} : vector<8x128xf32> to vector<8x32xf32>
    %129 = vector.extract_strided_slice %127 {offsets = [0, 32], sizes = [8, 32], strides = [1, 1]} : vector<8x128xf32> to vector<8x32xf32>
    %130 = vector.extract_strided_slice %127 {offsets = [0, 64], sizes = [8, 32], strides = [1, 1]} : vector<8x128xf32> to vector<8x32xf32>
    %131 = vector.extract_strided_slice %127 {offsets = [0, 96], sizes = [8, 32], strides = [1, 1]} : vector<8x128xf32> to vector<8x32xf32>
    %132 = arith.mulf %129, %86 : vector<8x32xf32>
    %133 = arith.mulf %128, %130 : vector<8x32xf32>
    %134 = arith.addf %132, %133 : vector<8x32xf32>
    %135 = math.tanh %134 : vector<8x32xf32>
    %136 = arith.mulf %131, %135 : vector<8x32xf32>
    %137 = tpu.concatenate %136, %110 in 1 : vector<8x32xf32>, vector<8x32xf32> -> vector<8x64xf32>
    %cst_41 = arith.constant dense<0.000000e+00> : vector<8x128xf32>
    %138 = tpu.matmul %137, %8, %cst_41 {dimension_numbers = #tpu.dot_dimension_numbers<[1], [0], [0], [1], [0, 0, 1, 1], [], []>} : vector<8x64xf32>, vector<64x128xf32>, vector<8x128xf32> -> vector<8x128xf32>
    %139 = vector.broadcast %9 : vector<1x128xf32> to vector<8x128xf32>
    %140 = arith.addf %138, %139 : vector<8x128xf32>
    %cst_42 = arith.constant 5.000000e-01 : f32
    %141 = vector.broadcast %cst_42 : f32 to vector<8x128xf32>
    %142 = arith.mulf %141, %140 : vector<8x128xf32>
    %143 = arith.select %15, %140, %142 : vector<8x128xi1>, vector<8x128xf32>
    %144 = math.tanh %143 : vector<8x128xf32>
    %cst_43 = arith.constant 5.000000e-01 : f32
    %145 = vector.broadcast %cst_43 : f32 to vector<8x128xf32>
    %146 = arith.mulf %145, %144 : vector<8x128xf32>
    %cst_44 = arith.constant 5.000000e-01 : f32
    %147 = vector.broadcast %cst_44 : f32 to vector<8x128xf32>
    %148 = arith.addf %146, %147 : vector<8x128xf32>
    %149 = arith.select %15, %144, %148 : vector<8x128xi1>, vector<8x128xf32>
    %150 = vector.extract_strided_slice %149 {offsets = [0, 0], sizes = [8, 32], strides = [1, 1]} : vector<8x128xf32> to vector<8x32xf32>
    %151 = vector.extract_strided_slice %149 {offsets = [0, 32], sizes = [8, 32], strides = [1, 1]} : vector<8x128xf32> to vector<8x32xf32>
    %152 = vector.extract_strided_slice %149 {offsets = [0, 64], sizes = [8, 32], strides = [1, 1]} : vector<8x128xf32> to vector<8x32xf32>
    %153 = vector.extract_strided_slice %149 {offsets = [0, 96], sizes = [8, 32], strides = [1, 1]} : vector<8x128xf32> to vector<8x32xf32>
    %154 = arith.mulf %151, %108 : vector<8x32xf32>
    %155 = arith.mulf %150, %152 : vector<8x32xf32>
    %156 = arith.addf %154, %155 : vector<8x32xf32>
    %157 = math.tanh %156 : vector<8x32xf32>
    %158 = arith.mulf %153, %157 : vector<8x32xf32>
    %159 = arith.index_cast %114 : i32 to index
    %c0_45 = arith.constant 0 : index
    %160 = vector.load %arg10[%159, %c0_45] : memref<64x32xf32, #tpu.memory_space<vmem>>, vector<8x32xf32>
    tpu.vector_store %arg10[%159, %c0_45], %158 {strides = array<i32>} : memref<64x32xf32, #tpu.memory_space<vmem>>, vector<8x32xf32>,
    %c3_i32 = arith.constant 3 : i32
    %c8_i32_46 = arith.constant 8 : i32
    %161 = arith.muli %c3_i32, %c8_i32_46 : i32
    %162 = tpu.assume_multiple %161, 8 : i32
    %163 = arith.index_cast %162 : i32 to index
    %c0_47 = arith.constant 0 : index
    %164 = vector.load %arg9[%163, %c0_47] : memref<64x128xf32, #tpu.memory_space<vmem>>, vector<8x128xf32>
    %cst_48 = arith.constant dense<0.000000e+00> : vector<8x128xf32>
    %165 = tpu.matmul %136, %7, %cst_48 {dimension_numbers = #tpu.dot_dimension_numbers<[1], [0], [0], [1], [0, 0, 1, 1], [], []>} : vector<8x32xf32>, vector<32x128xf32>, vector<8x128xf32> -> vector<8x128xf32>
    %166 = arith.addf %164, %165 : vector<8x128xf32>
    %cst_49 = arith.constant 5.000000e-01 : f32
    %167 = vector.broadcast %cst_49 : f32 to vector<8x128xf32>
    %168 = arith.mulf %167, %166 : vector<8x128xf32>
    %169 = arith.select %15, %166, %168 : vector<8x128xi1>, vector<8x128xf32>
    %170 = math.tanh %169 : vector<8x128xf32>
    %cst_50 = arith.constant 5.000000e-01 : f32
    %171 = vector.broadcast %cst_50 : f32 to vector<8x128xf32>
    %172 = arith.mulf %171, %170 : vector<8x128xf32>
    %cst_51 = arith.constant 5.000000e-01 : f32
    %173 = vector.broadcast %cst_51 : f32 to vector<8x128xf32>
    %174 = arith.addf %172, %173 : vector<8x128xf32>
    %175 = arith.select %15, %170, %174 : vector<8x128xi1>, vector<8x128xf32>
    %176 = vector.extract_strided_slice %175 {offsets = [0, 0], sizes = [8, 32], strides = [1, 1]} : vector<8x128xf32> to vector<8x32xf32>
    %177 = vector.extract_strided_slice %175 {offsets = [0, 32], sizes = [8, 32], strides = [1, 1]} : vector<8x128xf32> to vector<8x32xf32>
    %178 = vector.extract_strided_slice %175 {offsets = [0, 64], sizes = [8, 32], strides = [1, 1]} : vector<8x128xf32> to vector<8x32xf32>
    %179 = vector.extract_strided_slice %175 {offsets = [0, 96], sizes = [8, 32], strides = [1, 1]} : vector<8x128xf32> to vector<8x32xf32>
    %180 = arith.mulf %177, %134 : vector<8x32xf32>
    %181 = arith.mulf %176, %178 : vector<8x32xf32>
    %182 = arith.addf %180, %181 : vector<8x32xf32>
    %183 = math.tanh %182 : vector<8x32xf32>
    %184 = arith.mulf %179, %183 : vector<8x32xf32>
    %185 = tpu.concatenate %184, %158 in 1 : vector<8x32xf32>, vector<8x32xf32> -> vector<8x64xf32>
    %cst_52 = arith.constant dense<0.000000e+00> : vector<8x128xf32>
    %186 = tpu.matmul %185, %8, %cst_52 {dimension_numbers = #tpu.dot_dimension_numbers<[1], [0], [0], [1], [0, 0, 1, 1], [], []>} : vector<8x64xf32>, vector<64x128xf32>, vector<8x128xf32> -> vector<8x128xf32>
    %187 = vector.broadcast %9 : vector<1x128xf32> to vector<8x128xf32>
    %188 = arith.addf %186, %187 : vector<8x128xf32>
    %cst_53 = arith.constant 5.000000e-01 : f32
    %189 = vector.broadcast %cst_53 : f32 to vector<8x128xf32>
    %190 = arith.mulf %189, %188 : vector<8x128xf32>
    %191 = arith.select %15, %188, %190 : vector<8x128xi1>, vector<8x128xf32>
    %192 = math.tanh %191 : vector<8x128xf32>
    %cst_54 = arith.constant 5.000000e-01 : f32
    %193 = vector.broadcast %cst_54 : f32 to vector<8x128xf32>
    %194 = arith.mulf %193, %192 : vector<8x128xf32>
    %cst_55 = arith.constant 5.000000e-01 : f32
    %195 = vector.broadcast %cst_55 : f32 to vector<8x128xf32>
    %196 = arith.addf %194, %195 : vector<8x128xf32>
    %197 = arith.select %15, %192, %196 : vector<8x128xi1>, vector<8x128xf32>
    %198 = vector.extract_strided_slice %197 {offsets = [0, 0], sizes = [8, 32], strides = [1, 1]} : vector<8x128xf32> to vector<8x32xf32>
    %199 = vector.extract_strided_slice %197 {offsets = [0, 32], sizes = [8, 32], strides = [1, 1]} : vector<8x128xf32> to vector<8x32xf32>
    %200 = vector.extract_strided_slice %197 {offsets = [0, 64], sizes = [8, 32], strides = [1, 1]} : vector<8x128xf32> to vector<8x32xf32>
    %201 = vector.extract_strided_slice %197 {offsets = [0, 96], sizes = [8, 32], strides = [1, 1]} : vector<8x128xf32> to vector<8x32xf32>
    %202 = arith.mulf %199, %156 : vector<8x32xf32>
    %203 = arith.mulf %198, %200 : vector<8x32xf32>
    %204 = arith.addf %202, %203 : vector<8x32xf32>
    %205 = math.tanh %204 : vector<8x32xf32>
    %206 = arith.mulf %201, %205 : vector<8x32xf32>
    %207 = arith.index_cast %162 : i32 to index
    %c0_56 = arith.constant 0 : index
    %208 = vector.load %arg10[%207, %c0_56] : memref<64x32xf32, #tpu.memory_space<vmem>>, vector<8x32xf32>
    tpu.vector_store %arg10[%207, %c0_56], %206 {strides = array<i32>} : memref<64x32xf32, #tpu.memory_space<vmem>>, vector<8x32xf32>,
    %c4_i32 = arith.constant 4 : i32
    %c8_i32_57 = arith.constant 8 : i32
    %209 = arith.muli %c4_i32, %c8_i32_57 : i32
    %210 = tpu.assume_multiple %209, 8 : i32
    %211 = arith.index_cast %210 : i32 to index
    %c0_58 = arith.constant 0 : index
    %212 = vector.load %arg9[%211, %c0_58] : memref<64x128xf32, #tpu.memory_space<vmem>>, vector<8x128xf32>
    %cst_59 = arith.constant dense<0.000000e+00> : vector<8x128xf32>
    %213 = tpu.matmul %184, %7, %cst_59 {dimension_numbers = #tpu.dot_dimension_numbers<[1], [0], [0], [1], [0, 0, 1, 1], [], []>} : vector<8x32xf32>, vector<32x128xf32>, vector<8x128xf32> -> vector<8x128xf32>
    %214 = arith.addf %212, %213 : vector<8x128xf32>
    %cst_60 = arith.constant 5.000000e-01 : f32
    %215 = vector.broadcast %cst_60 : f32 to vector<8x128xf32>
    %216 = arith.mulf %215, %214 : vector<8x128xf32>
    %217 = arith.select %15, %214, %216 : vector<8x128xi1>, vector<8x128xf32>
    %218 = math.tanh %217 : vector<8x128xf32>
    %cst_61 = arith.constant 5.000000e-01 : f32
    %219 = vector.broadcast %cst_61 : f32 to vector<8x128xf32>
    %220 = arith.mulf %219, %218 : vector<8x128xf32>
    %cst_62 = arith.constant 5.000000e-01 : f32
    %221 = vector.broadcast %cst_62 : f32 to vector<8x128xf32>
    %222 = arith.addf %220, %221 : vector<8x128xf32>
    %223 = arith.select %15, %218, %222 : vector<8x128xi1>, vector<8x128xf32>
    %224 = vector.extract_strided_slice %223 {offsets = [0, 0], sizes = [8, 32], strides = [1, 1]} : vector<8x128xf32> to vector<8x32xf32>
    %225 = vector.extract_strided_slice %223 {offsets = [0, 32], sizes = [8, 32], strides = [1, 1]} : vector<8x128xf32> to vector<8x32xf32>
    %226 = vector.extract_strided_slice %223 {offsets = [0, 64], sizes = [8, 32], strides = [1, 1]} : vector<8x128xf32> to vector<8x32xf32>
    %227 = vector.extract_strided_slice %223 {offsets = [0, 96], sizes = [8, 32], strides = [1, 1]} : vector<8x128xf32> to vector<8x32xf32>
    %228 = arith.mulf %225, %182 : vector<8x32xf32>
    %229 = arith.mulf %224, %226 : vector<8x32xf32>
    %230 = arith.addf %228, %229 : vector<8x32xf32>
    %231 = math.tanh %230 : vector<8x32xf32>
    %232 = arith.mulf %227, %231 : vector<8x32xf32>
    %233 = tpu.concatenate %232, %206 in 1 : vector<8x32xf32>, vector<8x32xf32> -> vector<8x64xf32>
    %cst_63 = arith.constant dense<0.000000e+00> : vector<8x128xf32>
    %234 = tpu.matmul %233, %8, %cst_63 {dimension_numbers = #tpu.dot_dimension_numbers<[1], [0], [0], [1], [0, 0, 1, 1], [], []>} : vector<8x64xf32>, vector<64x128xf32>, vector<8x128xf32> -> vector<8x128xf32>
    %235 = vector.broadcast %9 : vector<1x128xf32> to vector<8x128xf32>
    %236 = arith.addf %234, %235 : vector<8x128xf32>
    %cst_64 = arith.constant 5.000000e-01 : f32
    %237 = vector.broadcast %cst_64 : f32 to vector<8x128xf32>
    %238 = arith.mulf %237, %236 : vector<8x128xf32>
    %239 = arith.select %15, %236, %238 : vector<8x128xi1>, vector<8x128xf32>
    %240 = math.tanh %239 : vector<8x128xf32>
    %cst_65 = arith.constant 5.000000e-01 : f32
    %241 = vector.broadcast %cst_65 : f32 to vector<8x128xf32>
    %242 = arith.mulf %241, %240 : vector<8x128xf32>
    %cst_66 = arith.constant 5.000000e-01 : f32
    %243 = vector.broadcast %cst_66 : f32 to vector<8x128xf32>
    %244 = arith.addf %242, %243 : vector<8x128xf32>
    %245 = arith.select %15, %240, %244 : vector<8x128xi1>, vector<8x128xf32>
    %246 = vector.extract_strided_slice %245 {offsets = [0, 0], sizes = [8, 32], strides = [1, 1]} : vector<8x128xf32> to vector<8x32xf32>
    %247 = vector.extract_strided_slice %245 {offsets = [0, 32], sizes = [8, 32], strides = [1, 1]} : vector<8x128xf32> to vector<8x32xf32>
    %248 = vector.extract_strided_slice %245 {offsets = [0, 64], sizes = [8, 32], strides = [1, 1]} : vector<8x128xf32> to vector<8x32xf32>
    %249 = vector.extract_strided_slice %245 {offsets = [0, 96], sizes = [8, 32], strides = [1, 1]} : vector<8x128xf32> to vector<8x32xf32>
    %250 = arith.mulf %247, %204 : vector<8x32xf32>
    %251 = arith.mulf %246, %248 : vector<8x32xf32>
    %252 = arith.addf %250, %251 : vector<8x32xf32>
    %253 = math.tanh %252 : vector<8x32xf32>
    %254 = arith.mulf %249, %253 : vector<8x32xf32>
    %255 = arith.index_cast %210 : i32 to index
    %c0_67 = arith.constant 0 : index
    %256 = vector.load %arg10[%255, %c0_67] : memref<64x32xf32, #tpu.memory_space<vmem>>, vector<8x32xf32>
    tpu.vector_store %arg10[%255, %c0_67], %254 {strides = array<i32>} : memref<64x32xf32, #tpu.memory_space<vmem>>, vector<8x32xf32>,
    %c5_i32 = arith.constant 5 : i32
    %c8_i32_68 = arith.constant 8 : i32
    %257 = arith.muli %c5_i32, %c8_i32_68 : i32
    %258 = tpu.assume_multiple %257, 8 : i32
    %259 = arith.index_cast %258 : i32 to index
    %c0_69 = arith.constant 0 : index
    %260 = vector.load %arg9[%259, %c0_69] : memref<64x128xf32, #tpu.memory_space<vmem>>, vector<8x128xf32>
    %cst_70 = arith.constant dense<0.000000e+00> : vector<8x128xf32>
    %261 = tpu.matmul %232, %7, %cst_70 {dimension_numbers = #tpu.dot_dimension_numbers<[1], [0], [0], [1], [0, 0, 1, 1], [], []>} : vector<8x32xf32>, vector<32x128xf32>, vector<8x128xf32> -> vector<8x128xf32>
    %262 = arith.addf %260, %261 : vector<8x128xf32>
    %cst_71 = arith.constant 5.000000e-01 : f32
    %263 = vector.broadcast %cst_71 : f32 to vector<8x128xf32>
    %264 = arith.mulf %263, %262 : vector<8x128xf32>
    %265 = arith.select %15, %262, %264 : vector<8x128xi1>, vector<8x128xf32>
    %266 = math.tanh %265 : vector<8x128xf32>
    %cst_72 = arith.constant 5.000000e-01 : f32
    %267 = vector.broadcast %cst_72 : f32 to vector<8x128xf32>
    %268 = arith.mulf %267, %266 : vector<8x128xf32>
    %cst_73 = arith.constant 5.000000e-01 : f32
    %269 = vector.broadcast %cst_73 : f32 to vector<8x128xf32>
    %270 = arith.addf %268, %269 : vector<8x128xf32>
    %271 = arith.select %15, %266, %270 : vector<8x128xi1>, vector<8x128xf32>
    %272 = vector.extract_strided_slice %271 {offsets = [0, 0], sizes = [8, 32], strides = [1, 1]} : vector<8x128xf32> to vector<8x32xf32>
    %273 = vector.extract_strided_slice %271 {offsets = [0, 32], sizes = [8, 32], strides = [1, 1]} : vector<8x128xf32> to vector<8x32xf32>
    %274 = vector.extract_strided_slice %271 {offsets = [0, 64], sizes = [8, 32], strides = [1, 1]} : vector<8x128xf32> to vector<8x32xf32>
    %275 = vector.extract_strided_slice %271 {offsets = [0, 96], sizes = [8, 32], strides = [1, 1]} : vector<8x128xf32> to vector<8x32xf32>
    %276 = arith.mulf %273, %230 : vector<8x32xf32>
    %277 = arith.mulf %272, %274 : vector<8x32xf32>
    %278 = arith.addf %276, %277 : vector<8x32xf32>
    %279 = math.tanh %278 : vector<8x32xf32>
    %280 = arith.mulf %275, %279 : vector<8x32xf32>
    %281 = tpu.concatenate %280, %254 in 1 : vector<8x32xf32>, vector<8x32xf32> -> vector<8x64xf32>
    %cst_74 = arith.constant dense<0.000000e+00> : vector<8x128xf32>
    %282 = tpu.matmul %281, %8, %cst_74 {dimension_numbers = #tpu.dot_dimension_numbers<[1], [0], [0], [1], [0, 0, 1, 1], [], []>} : vector<8x64xf32>, vector<64x128xf32>, vector<8x128xf32> -> vector<8x128xf32>
    %283 = vector.broadcast %9 : vector<1x128xf32> to vector<8x128xf32>
    %284 = arith.addf %282, %283 : vector<8x128xf32>
    %cst_75 = arith.constant 5.000000e-01 : f32
    %285 = vector.broadcast %cst_75 : f32 to vector<8x128xf32>
    %286 = arith.mulf %285, %284 : vector<8x128xf32>
    %287 = arith.select %15, %284, %286 : vector<8x128xi1>, vector<8x128xf32>
    %288 = math.tanh %287 : vector<8x128xf32>
    %cst_76 = arith.constant 5.000000e-01 : f32
    %289 = vector.broadcast %cst_76 : f32 to vector<8x128xf32>
    %290 = arith.mulf %289, %288 : vector<8x128xf32>
    %cst_77 = arith.constant 5.000000e-01 : f32
    %291 = vector.broadcast %cst_77 : f32 to vector<8x128xf32>
    %292 = arith.addf %290, %291 : vector<8x128xf32>
    %293 = arith.select %15, %288, %292 : vector<8x128xi1>, vector<8x128xf32>
    %294 = vector.extract_strided_slice %293 {offsets = [0, 0], sizes = [8, 32], strides = [1, 1]} : vector<8x128xf32> to vector<8x32xf32>
    %295 = vector.extract_strided_slice %293 {offsets = [0, 32], sizes = [8, 32], strides = [1, 1]} : vector<8x128xf32> to vector<8x32xf32>
    %296 = vector.extract_strided_slice %293 {offsets = [0, 64], sizes = [8, 32], strides = [1, 1]} : vector<8x128xf32> to vector<8x32xf32>
    %297 = vector.extract_strided_slice %293 {offsets = [0, 96], sizes = [8, 32], strides = [1, 1]} : vector<8x128xf32> to vector<8x32xf32>
    %298 = arith.mulf %295, %252 : vector<8x32xf32>
    %299 = arith.mulf %294, %296 : vector<8x32xf32>
    %300 = arith.addf %298, %299 : vector<8x32xf32>
    %301 = math.tanh %300 : vector<8x32xf32>
    %302 = arith.mulf %297, %301 : vector<8x32xf32>
    %303 = arith.index_cast %258 : i32 to index
    %c0_78 = arith.constant 0 : index
    %304 = vector.load %arg10[%303, %c0_78] : memref<64x32xf32, #tpu.memory_space<vmem>>, vector<8x32xf32>
    tpu.vector_store %arg10[%303, %c0_78], %302 {strides = array<i32>} : memref<64x32xf32, #tpu.memory_space<vmem>>, vector<8x32xf32>,
    %c6_i32 = arith.constant 6 : i32
    %c8_i32_79 = arith.constant 8 : i32
    %305 = arith.muli %c6_i32, %c8_i32_79 : i32
    %306 = tpu.assume_multiple %305, 8 : i32
    %307 = arith.index_cast %306 : i32 to index
    %c0_80 = arith.constant 0 : index
    %308 = vector.load %arg9[%307, %c0_80] : memref<64x128xf32, #tpu.memory_space<vmem>>, vector<8x128xf32>
    %cst_81 = arith.constant dense<0.000000e+00> : vector<8x128xf32>
    %309 = tpu.matmul %280, %7, %cst_81 {dimension_numbers = #tpu.dot_dimension_numbers<[1], [0], [0], [1], [0, 0, 1, 1], [], []>} : vector<8x32xf32>, vector<32x128xf32>, vector<8x128xf32> -> vector<8x128xf32>
    %310 = arith.addf %308, %309 : vector<8x128xf32>
    %cst_82 = arith.constant 5.000000e-01 : f32
    %311 = vector.broadcast %cst_82 : f32 to vector<8x128xf32>
    %312 = arith.mulf %311, %310 : vector<8x128xf32>
    %313 = arith.select %15, %310, %312 : vector<8x128xi1>, vector<8x128xf32>
    %314 = math.tanh %313 : vector<8x128xf32>
    %cst_83 = arith.constant 5.000000e-01 : f32
    %315 = vector.broadcast %cst_83 : f32 to vector<8x128xf32>
    %316 = arith.mulf %315, %314 : vector<8x128xf32>
    %cst_84 = arith.constant 5.000000e-01 : f32
    %317 = vector.broadcast %cst_84 : f32 to vector<8x128xf32>
    %318 = arith.addf %316, %317 : vector<8x128xf32>
    %319 = arith.select %15, %314, %318 : vector<8x128xi1>, vector<8x128xf32>
    %320 = vector.extract_strided_slice %319 {offsets = [0, 0], sizes = [8, 32], strides = [1, 1]} : vector<8x128xf32> to vector<8x32xf32>
    %321 = vector.extract_strided_slice %319 {offsets = [0, 32], sizes = [8, 32], strides = [1, 1]} : vector<8x128xf32> to vector<8x32xf32>
    %322 = vector.extract_strided_slice %319 {offsets = [0, 64], sizes = [8, 32], strides = [1, 1]} : vector<8x128xf32> to vector<8x32xf32>
    %323 = vector.extract_strided_slice %319 {offsets = [0, 96], sizes = [8, 32], strides = [1, 1]} : vector<8x128xf32> to vector<8x32xf32>
    %324 = arith.mulf %321, %278 : vector<8x32xf32>
    %325 = arith.mulf %320, %322 : vector<8x32xf32>
    %326 = arith.addf %324, %325 : vector<8x32xf32>
    %327 = math.tanh %326 : vector<8x32xf32>
    %328 = arith.mulf %323, %327 : vector<8x32xf32>
    %329 = tpu.concatenate %328, %302 in 1 : vector<8x32xf32>, vector<8x32xf32> -> vector<8x64xf32>
    %cst_85 = arith.constant dense<0.000000e+00> : vector<8x128xf32>
    %330 = tpu.matmul %329, %8, %cst_85 {dimension_numbers = #tpu.dot_dimension_numbers<[1], [0], [0], [1], [0, 0, 1, 1], [], []>} : vector<8x64xf32>, vector<64x128xf32>, vector<8x128xf32> -> vector<8x128xf32>
    %331 = vector.broadcast %9 : vector<1x128xf32> to vector<8x128xf32>
    %332 = arith.addf %330, %331 : vector<8x128xf32>
    %cst_86 = arith.constant 5.000000e-01 : f32
    %333 = vector.broadcast %cst_86 : f32 to vector<8x128xf32>
    %334 = arith.mulf %333, %332 : vector<8x128xf32>
    %335 = arith.select %15, %332, %334 : vector<8x128xi1>, vector<8x128xf32>
    %336 = math.tanh %335 : vector<8x128xf32>
    %cst_87 = arith.constant 5.000000e-01 : f32
    %337 = vector.broadcast %cst_87 : f32 to vector<8x128xf32>
    %338 = arith.mulf %337, %336 : vector<8x128xf32>
    %cst_88 = arith.constant 5.000000e-01 : f32
    %339 = vector.broadcast %cst_88 : f32 to vector<8x128xf32>
    %340 = arith.addf %338, %339 : vector<8x128xf32>
    %341 = arith.select %15, %336, %340 : vector<8x128xi1>, vector<8x128xf32>
    %342 = vector.extract_strided_slice %341 {offsets = [0, 0], sizes = [8, 32], strides = [1, 1]} : vector<8x128xf32> to vector<8x32xf32>
    %343 = vector.extract_strided_slice %341 {offsets = [0, 32], sizes = [8, 32], strides = [1, 1]} : vector<8x128xf32> to vector<8x32xf32>
    %344 = vector.extract_strided_slice %341 {offsets = [0, 64], sizes = [8, 32], strides = [1, 1]} : vector<8x128xf32> to vector<8x32xf32>
    %345 = vector.extract_strided_slice %341 {offsets = [0, 96], sizes = [8, 32], strides = [1, 1]} : vector<8x128xf32> to vector<8x32xf32>
    %346 = arith.mulf %343, %300 : vector<8x32xf32>
    %347 = arith.mulf %342, %344 : vector<8x32xf32>
    %348 = arith.addf %346, %347 : vector<8x32xf32>
    %349 = math.tanh %348 : vector<8x32xf32>
    %350 = arith.mulf %345, %349 : vector<8x32xf32>
    %351 = arith.index_cast %306 : i32 to index
    %c0_89 = arith.constant 0 : index
    %352 = vector.load %arg10[%351, %c0_89] : memref<64x32xf32, #tpu.memory_space<vmem>>, vector<8x32xf32>
    tpu.vector_store %arg10[%351, %c0_89], %350 {strides = array<i32>} : memref<64x32xf32, #tpu.memory_space<vmem>>, vector<8x32xf32>,
    %c7_i32 = arith.constant 7 : i32
    %c8_i32_90 = arith.constant 8 : i32
    %353 = arith.muli %c7_i32, %c8_i32_90 : i32
    %354 = tpu.assume_multiple %353, 8 : i32
    %355 = arith.index_cast %354 : i32 to index
    %c0_91 = arith.constant 0 : index
    %356 = vector.load %arg9[%355, %c0_91] : memref<64x128xf32, #tpu.memory_space<vmem>>, vector<8x128xf32>
    %cst_92 = arith.constant dense<0.000000e+00> : vector<8x128xf32>
    %357 = tpu.matmul %328, %7, %cst_92 {dimension_numbers = #tpu.dot_dimension_numbers<[1], [0], [0], [1], [0, 0, 1, 1], [], []>} : vector<8x32xf32>, vector<32x128xf32>, vector<8x128xf32> -> vector<8x128xf32>
    %358 = arith.addf %356, %357 : vector<8x128xf32>
    %cst_93 = arith.constant 5.000000e-01 : f32
    %359 = vector.broadcast %cst_93 : f32 to vector<8x128xf32>
    %360 = arith.mulf %359, %358 : vector<8x128xf32>
    %361 = arith.select %15, %358, %360 : vector<8x128xi1>, vector<8x128xf32>
    %362 = math.tanh %361 : vector<8x128xf32>
    %cst_94 = arith.constant 5.000000e-01 : f32
    %363 = vector.broadcast %cst_94 : f32 to vector<8x128xf32>
    %364 = arith.mulf %363, %362 : vector<8x128xf32>
    %cst_95 = arith.constant 5.000000e-01 : f32
    %365 = vector.broadcast %cst_95 : f32 to vector<8x128xf32>
    %366 = arith.addf %364, %365 : vector<8x128xf32>
    %367 = arith.select %15, %362, %366 : vector<8x128xi1>, vector<8x128xf32>
    %368 = vector.extract_strided_slice %367 {offsets = [0, 0], sizes = [8, 32], strides = [1, 1]} : vector<8x128xf32> to vector<8x32xf32>
    %369 = vector.extract_strided_slice %367 {offsets = [0, 32], sizes = [8, 32], strides = [1, 1]} : vector<8x128xf32> to vector<8x32xf32>
    %370 = vector.extract_strided_slice %367 {offsets = [0, 64], sizes = [8, 32], strides = [1, 1]} : vector<8x128xf32> to vector<8x32xf32>
    %371 = vector.extract_strided_slice %367 {offsets = [0, 96], sizes = [8, 32], strides = [1, 1]} : vector<8x128xf32> to vector<8x32xf32>
    %372 = arith.mulf %369, %326 : vector<8x32xf32>
    %373 = arith.mulf %368, %370 : vector<8x32xf32>
    %374 = arith.addf %372, %373 : vector<8x32xf32>
    %375 = math.tanh %374 : vector<8x32xf32>
    %376 = arith.mulf %371, %375 : vector<8x32xf32>
    %377 = tpu.concatenate %376, %350 in 1 : vector<8x32xf32>, vector<8x32xf32> -> vector<8x64xf32>
    %cst_96 = arith.constant dense<0.000000e+00> : vector<8x128xf32>
    %378 = tpu.matmul %377, %8, %cst_96 {dimension_numbers = #tpu.dot_dimension_numbers<[1], [0], [0], [1], [0, 0, 1, 1], [], []>} : vector<8x64xf32>, vector<64x128xf32>, vector<8x128xf32> -> vector<8x128xf32>
    %379 = vector.broadcast %9 : vector<1x128xf32> to vector<8x128xf32>
    %380 = arith.addf %378, %379 : vector<8x128xf32>
    %cst_97 = arith.constant 5.000000e-01 : f32
    %381 = vector.broadcast %cst_97 : f32 to vector<8x128xf32>
    %382 = arith.mulf %381, %380 : vector<8x128xf32>
    %383 = arith.select %15, %380, %382 : vector<8x128xi1>, vector<8x128xf32>
    %384 = math.tanh %383 : vector<8x128xf32>
    %cst_98 = arith.constant 5.000000e-01 : f32
    %385 = vector.broadcast %cst_98 : f32 to vector<8x128xf32>
    %386 = arith.mulf %385, %384 : vector<8x128xf32>
    %cst_99 = arith.constant 5.000000e-01 : f32
    %387 = vector.broadcast %cst_99 : f32 to vector<8x128xf32>
    %388 = arith.addf %386, %387 : vector<8x128xf32>
    %389 = arith.select %15, %384, %388 : vector<8x128xi1>, vector<8x128xf32>
    %390 = vector.extract_strided_slice %389 {offsets = [0, 0], sizes = [8, 32], strides = [1, 1]} : vector<8x128xf32> to vector<8x32xf32>
    %391 = vector.extract_strided_slice %389 {offsets = [0, 32], sizes = [8, 32], strides = [1, 1]} : vector<8x128xf32> to vector<8x32xf32>
    %392 = vector.extract_strided_slice %389 {offsets = [0, 64], sizes = [8, 32], strides = [1, 1]} : vector<8x128xf32> to vector<8x32xf32>
    %393 = vector.extract_strided_slice %389 {offsets = [0, 96], sizes = [8, 32], strides = [1, 1]} : vector<8x128xf32> to vector<8x32xf32>
    %394 = arith.mulf %391, %348 : vector<8x32xf32>
    %395 = arith.mulf %390, %392 : vector<8x32xf32>
    %396 = arith.addf %394, %395 : vector<8x32xf32>
    %397 = math.tanh %396 : vector<8x32xf32>
    %398 = arith.mulf %393, %397 : vector<8x32xf32>
    %399 = arith.index_cast %354 : i32 to index
    %c0_100 = arith.constant 0 : index
    %400 = vector.load %arg10[%399, %c0_100] : memref<64x32xf32, #tpu.memory_space<vmem>>, vector<8x32xf32>
    tpu.vector_store %arg10[%399, %c0_100], %398 {strides = array<i32>} : memref<64x32xf32, #tpu.memory_space<vmem>>, vector<8x32xf32>,
    %c8_i32_101 = arith.constant 8 : i32
    %c0_102 = arith.constant 0 : index
    %c0_103 = arith.constant 0 : index
    %401 = vector.load %arg10[%c0_102, %c0_103] : memref<64x32xf32, #tpu.memory_space<vmem>>, vector<64x32xf32>
    %c0_104 = arith.constant 0 : index
    %c0_105 = arith.constant 0 : index
    %402 = vector.load %arg6[%c0_104, %c0_105] : memref<32x1xf32, #tpu.memory_space<vmem>>, vector<32x1xf32>
    %cst_106 = arith.constant dense<0.000000e+00> : vector<64x1xf32>
    %403 = tpu.matmul %401, %402, %cst_106 {dimension_numbers = #tpu.dot_dimension_numbers<[1], [0], [0], [1], [0, 0, 1, 1], [], []>} : vector<64x32xf32>, vector<32x1xf32>, vector<64x1xf32> -> vector<64x1xf32>
    %c0_107 = arith.constant 0 : index
    %c0_108 = arith.constant 0 : index
    %404 = vector.load %arg7[%c0_107, %c0_108] : memref<1x1xf32, #tpu.memory_space<vmem>>, vector<1x1xf32>
    %405 = vector.broadcast %404 : vector<1x1xf32> to vector<64x1xf32>
    %406 = arith.addf %403, %405 : vector<64x1xf32>
    %c0_109 = arith.constant 0 : index
    %c0_110 = arith.constant 0 : index
    %407 = vector.load %arg8[%c0_109, %c0_110] : memref<64x1xf32, #tpu.memory_space<vmem>>, vector<64x1xf32>
    tpu.vector_store %arg8[%c0_109, %c0_110], %406 {strides = array<i32>} : memref<64x1xf32, #tpu.memory_space<vmem>>, vector<64x1xf32>,
    return
  }
}

</mosaic_0001>

<bundles_post_ra>
// kernel: tpu_custom_call.1
= control target key start
LH: loop header
LB: loop body
LE: loop exit
PB: predicated region body
PF: predicated region fallthrough
CT: control target
= control target key end

     0   :  { %s1788_s0 = inlined_call_operand.vmem [shape: f32[64,4], index: 0, kind: input, shape index: {}]   ;;  %s1789_s1 = inlined_call_operand.hbm [shape: f32[4,128], index: 1, kind: input, shape index: {}]   ;;  %s1790_s2 = inlined_call_operand.vmem [shape: f32[32,128], index: 2, kind: input, shape index: {}]   ;;  %s1791_s3 = inlined_call_operand.vmem [shape: f32[1,128], index: 3, kind: input, shape index: {}]   ;;  %s1792_s4 = inlined_call_operand.vmem [shape: f32[64,128], index: 4, kind: input, shape index: {}]   ;;  %s1793_s5 = inlined_call_operand.vmem [shape: f32[1,128], index: 5, kind: input, shape index: {}]   ;;  %s1794_s6 = inlined_call_operand.vmem [shape: f32[32,1], index: 6, kind: input, shape index: {}]   ;;  %s1795_s7 = inlined_call_operand.<no memory space> [shape: f32[1,1], index: 7, kind: input, shape index: {}]   ;;  %s1796_s8 = inlined_call_operand.vmem [shape: f32[64,1], index: 8, kind: output, shape index: {}]  }
   0x1   :  { %v13_v0 = vstv %s1795_s7 }
   0x2   :  { %14 = vst [vmem:[#allocation4] sm:$0x1] %v13_v0 }
   0x3   :  { %15 = vsyncpa [#allocation6], 0  ;;  %s23_s9 = sshll.u32 %s1789_s1, 4  ;;  %s1251_s10 = smov [#allocation5]   ;;  %s24_s9 = int_to_ptr.hbm [resolvable:$true] %s23_s9 }
   0x4   :  { %s25_s11 = sshll.u32 %s1251_s10, 4  ;;  %s26_s11 = int_to_ptr.vmem [resolvable:$true] %s25_s11 }
   0x5   :  { %28 = dma.hbm_to_vmem [thread:$0]  %s24_s9, 64, %s26_s11, [#allocation6]  }
   0x6   :  { %1249 = dma.done.wait [#allocation6], 64  }
   0x7   :  { %1250 = vsyncadd [#allocation6], 4294967232  ;;  %vm83_vm0 = vcmask 1043456   ;;  %vm58_vm1 = vcmask 31744   ;;  %v1309_v1 = vld [vmem:[%s1790_s2 + $0x18] sm:$0xff]  ;;  %v1314_v2 = vld [vmem:[%s1790_s2 + $0x10] sm:$0xff]  ;;  %v149_v8 = vlaneseq }
   0x8   :  { %v53_v3 = vld [vmem:[#allocation5] sm:$0xf]  ;;  %171 = vmatpush.msra.mxu1 %v1309_v1  ;;  %v1323_v5 = vld [vmem:[%s1790_s2 + $0x8] sm:$0xff]  ;;  %279 = vmatpush.msra.mxu3 %v1309_v1  ;;  %v1252_v7 = vmov 0.0   ;;  %v1345_v9 = vld [vmem:[%s1791_s3] ss:$0 sm:$0xff] }
   0x9   :  { %1114 = vmatpush.msk.msra.mxu0 %vm83_vm0, %v53_v3  ;;  %v45_v4 = vld [vmem:[%s1788_s0] sm:$0xff]  ;;  %v150_v11 = vand.u32 127, %v149_v8  ;;  %s1253_s3 = smov 64   ;;  %s1254_s21 = smov 32   ;;  %v1365_v28 = vld [vmem:[%s1792_s4 + $0x38] sm:$0xff]  ;;  %v1370_v29 = vld [vmem:[%s1792_s4 + $0x30] sm:$0xff] }
   0xa   :  { %1115 = vmatmul.msk.f32.vlgmr.msra.gmra.mxu0 %vm58_vm1, %v45_v4  ;;  %172 = vmatpush.msra.mxu1 %v1314_v2  ;;  %v1331_v6 = vld [vmem:[%s1790_s2] sm:$0xff]  ;;  %v1377_v30 = vld [vmem:[%s1792_s4 + $0x28] sm:$0xff]  ;;  %v1393_v32 = vld [vmem:[%s1792_s4 + $0x18] sm:$0xff]  ;;  %vm155_vm5 = vcmask 261120   ;;  %vm211_vm6 = vcmask 523264   ;;  %vm1100_vm7 = vcmask 7168  }
   0xb   :  { %280 = vmatpush.msra.mxu3 %v1314_v2  ;;  %vm151_vm2 = vcmp.ge.s32.totalorder %v150_v11, 64  ;;  %vm152_vm3 = vcmp.lt.s32.totalorder %v150_v11, 96  ;;  %223 = vmatpush.msra.mxu2 %v1365_v28  ;;  %v1385_v31 = vld [vmem:[%s1792_s4 + $0x20] sm:$0xff]  ;;  %v1401_v33 = vld [vmem:[%s1792_s4 + $0x10] sm:$0xff]  ;;  %v1409_v34 = vld [vmem:[%s1792_s4 + $0x8] sm:$0xff] }
   0xc   :  { %173 = vmatpush.msra.mxu1 %v1323_v5  ;;  %vm1348_vm4 = vmand %vm151_vm2, %vm152_vm3  ;;  %978 = vmatpush.msrb.mxu0 %v1365_v28  ;;  %v1422_v37 = vld [vmem:[%s1792_s4] sm:$0xff]  ;;  %v46_v38 = vld [vmem:[%s1788_s0 + $0x8] sm:$0xff] }
   0xd   :  { %281 = vmatpush.msra.mxu3 %v1323_v5  ;;  %224 = vmatpush.msra.mxu2 %v1370_v29  ;;  %v1466_v43 = vld [vmem:[%s1793_s5] ss:$0 sm:$0xff]  ;;  %v1029_v15 = vld [vmem:[%s1794_s6 + $0x10] sm:$0xff] }
   0xe   :  { %174 = vmatpush.msra.mxu1 %v1331_v6  ;;  %979 = vmatpush.msrb.mxu0 %v1370_v29 }
   0xf   :  { %175 = vmatmul.f32.vlgmr.msra.gmra.mxu1 %v1252_v7  ;;  %282 = vmatpush.msra.mxu3 %v1331_v6 }
  0x10   :  { %330 = vmatpush.msrb.mxu1 %v1365_v28  ;;  %225 = vmatpush.msra.mxu2 %v1377_v30 }
  0x11   :  { %387 = vmatpush.msrb.mxu3 %v1309_v1  ;;  %980 = vmatpush.msrb.mxu0 %v1377_v30 }
  0x12   :  { %331 = vmatpush.msrb.mxu1 %v1370_v29  ;;  %226 = vmatpush.msra.mxu2 %v1385_v31 }
  0x13   :  { %388 = vmatpush.msrb.mxu3 %v1314_v2  ;;  %981 = vmatpush.msrb.mxu0 %v1385_v31 }
  0x14   :  { %332 = vmatpush.msrb.mxu1 %v1377_v30  ;;  %227 = vmatpush.msra.mxu2 %v1393_v32 }
  0x15   :  { %389 = vmatpush.msrb.mxu3 %v1323_v5  ;;  %982 = vmatpush.msrb.mxu0 %v1393_v32 }
  0x16   :  { %333 = vmatpush.msrb.mxu1 %v1385_v31  ;;  %228 = vmatpush.msra.mxu2 %v1401_v33 }
  0x17   :  { %390 = vmatpush.msrb.mxu3 %v1331_v6  ;;  %983 = vmatpush.msrb.mxu0 %v1401_v33 }
  0x18   :  { %334 = vmatpush.msrb.mxu1 %v1393_v32  ;;  %229 = vmatpush.msra.mxu2 %v1409_v34 }
  0x19   :  { %984 = vmatpush.msrb.mxu0 %v1409_v34 }
  0x1a   :  { %335 = vmatpush.msrb.mxu1 %v1401_v33  ;;  %230 = vmatpush.msra.mxu2 %v1422_v37 }
  0x1b   :  { %1116 = vmatmul.msk.f32.gmra.mxu0 %vm58_vm1, %v46_v38 }
  0x1c   :  { %336 = vmatpush.msrb.mxu1 %v1409_v34  ;;  %438 = vmatpush.msrb.mxu2 %v1365_v28 }
  0x1d   :  { %985 = vmatpush.msrb.mxu0 %v1422_v37 }
  0x1e   :  { %337 = vmatpush.msrb.mxu1 %v1422_v37  ;;  %439 = vmatpush.msrb.mxu2 %v1370_v29 }
  0x20   :  { %546 = vmatpush.msra.mxu1 %v1365_v28  ;;  %440 = vmatpush.msrb.mxu2 %v1377_v30 }
  0x22   :  { %547 = vmatpush.msra.mxu1 %v1370_v29  ;;  %441 = vmatpush.msrb.mxu2 %v1385_v31 }
  0x24   :  { %548 = vmatpush.msra.mxu1 %v1377_v30  ;;  %442 = vmatpush.msrb.mxu2 %v1393_v32 }
  0x26   :  { %549 = vmatpush.msra.mxu1 %v1385_v31  ;;  %443 = vmatpush.msrb.mxu2 %v1401_v33 }
  0x28   :  { %550 = vmatpush.msra.mxu1 %v1393_v32  ;;  %444 = vmatpush.msrb.mxu2 %v1409_v34 }
  0x2a   :  { %551 = vmatpush.msra.mxu1 %v1401_v33  ;;  %445 = vmatpush.msrb.mxu2 %v1422_v37 }
  0x2c   :  { %552 = vmatpush.msra.mxu1 %v1409_v34 }
  0x2e   :  { %553 = vmatpush.msra.mxu1 %v1422_v37 }
  0x87   :  { %v104_v10 = vpop.f32.mrf.mxu0 }
  0x88   :  { %v105_v12 = vadd.f32 %v1345_v9, %v104_v10 }
  0x8c   :  { %v176_v13 = vpop.f32.mrf.mxu1 }
  0x8d   :  { %v179_v14 = vadd.f32 %v176_v13, %v105_v12 }
  0x8f   :  { %v180_v16 = vmul.f32 0.5, %v179_v14 }
  0x91   :  { %v181_v17 = vsel %vm1348_vm4, %v179_v14, %v180_v16 }
  0x92   :  { %1161 = vtanh.f32 %v181_v17 }
  0x98   :  { %v1162_v18 = vpop.eup %1161  ;;  %v107_v41 = vpop.f32.mrf.mxu0 }
  0x99   :  { %v183_v19 = vmul.f32 0.5, %v1162_v18  ;;  %v108_v42 = vadd.f32 %v1345_v9, %v107_v41 }
  0x9b   :  { %v184_v20 = vadd.f32 0.5, %v183_v19 }
  0x9d   :  { %v185_v21 = vsel %vm1348_vm4, %v1162_v18, %v184_v20  ;;  %v47_v18 = vld [vmem:[%s1788_s0 + $0x10] sm:$0xff] }
  0x9e   :  { %188 = vrot.lane.b32.xlu0 %v185_v21, %s1253_s3  ;;  %v186_v24 = vmul.f32 0.0, %v185_v21  ;;  %1117 = vmatmul.msk.f32.gmra.mxu0 %vm58_vm1, %v47_v18 }
 0x110   :  { %v189_v22 = vpop.permute.xlu0 %188 }
 0x111   :  { %v191_v23 = vmul.f32 %v189_v22, %v185_v21 }
 0x113   :  { %193 = vrot.lane.b32.xlu0 %v191_v23, %s1254_s21 }
 0x11b   :  { %v110_v22 = vpop.f32.mrf.mxu0 }
 0x11c   :  { %v111_v23 = vadd.f32 %v1345_v9, %v110_v22 }
 0x185   :  { %v194_v25 = vpop.permute.xlu0 %193 }
 0x186   :  { %v1358_v26 = vadd.f32 %v194_v25, %v186_v24 }
 0x188   :  { %1163 = vtanh.f32 %v1358_v26 }
 0x18e   :  { %v1164_v27 = vpop.eup %1163 }
 0x18f   :  { %199 = vrot.lane.b32.xlu1 %v1164_v27, %s1253_s3 }
 0x201   :  { %v200_v35 = vpop.permute.xlu1 %199 }
 0x202   :  { %v202_v36 = vmul.f32 %v200_v35, %v185_v21 }
 0x204   :  { %204 = vrot.lane.b32.xlu1 %v202_v36, %s1254_s21 }
 0x276   :  { %v205_v39 = vpop.permute.xlu1 %204 }
 0x277   :  { %1124 = vmatmul.msk.f32.vlgmr.msra.gmra.mxu3 %vm155_vm5, %v205_v39  ;;  %v207_v40 = vsel %vm155_vm5, %v205_v39, 0.0 }
 0x278   :  { %1123 = vmatmul.msk.f32.vlgmr.msra.gmra.mxu2 %vm211_vm6, %v207_v40  ;;  %495 = vmatpush.msra.mxu3 %v1309_v1 }
 0x279   :  { %654 = vmatpush.msra.mxu2 %v1365_v28 }
 0x27a   :  { %496 = vmatpush.msra.mxu3 %v1314_v2 }
 0x27b   :  { %655 = vmatpush.msra.mxu2 %v1370_v29 }
 0x27c   :  { %497 = vmatpush.msra.mxu3 %v1323_v5 }
 0x27d   :  { %656 = vmatpush.msra.mxu2 %v1377_v30 }
 0x27e   :  { %498 = vmatpush.msra.mxu3 %v1331_v6 }
 0x27f   :  { %657 = vmatpush.msra.mxu2 %v1385_v31 }
 0x281   :  { %658 = vmatpush.msra.mxu2 %v1393_v32 }
 0x283   :  { %659 = vmatpush.msra.mxu2 %v1401_v33 }
 0x285   :  { %660 = vmatpush.msra.mxu2 %v1409_v34 }
 0x287   :  { %661 = vmatpush.msra.mxu2 %v1422_v37 }
 0x2fa   :  { %v284_v44 = vpop.f32.mrf.mxu3 }
 0x2fb   :  { %v287_v45 = vadd.f32 %v284_v44, %v108_v42  ;;  %v232_v46 = vpop.f32.mrf.mxu2 }
 0x2fc   :  { %v233_v47 = vadd.f32 %v1466_v43, %v232_v46 }
 0x2fd   :  { %v288_v48 = vmul.f32 0.5, %v287_v45 }
 0x2fe   :  { %v235_v49 = vmul.f32 0.5, %v233_v47 }
 0x2ff   :  { %v289_v50 = vsel %vm1348_vm4, %v287_v45, %v288_v48 }
 0x300   :  { %1165 = vtanh.f32 %v289_v50  ;;  %v236_v51 = vsel %vm1348_vm4, %v233_v47, %v235_v49 }
 0x301   :  { %1167 = vtanh.f32 %v236_v51 }
 0x306   :  { %v1166_v52 = vpop.eup %1165 }
 0x307   :  { %v291_v53 = vmul.f32 0.5, %v1166_v52  ;;  %v1168_v54 = vpop.eup %1167 }
 0x308   :  { %v238_v57 = vmul.f32 0.5, %v1168_v54 }
 0x309   :  { %v292_v55 = vadd.f32 0.5, %v291_v53 }
 0x30a   :  { %v239_v58 = vadd.f32 0.5, %v238_v57 }
 0x30b   :  { %v293_v56 = vsel %vm1348_vm4, %v1166_v52, %v292_v55 }
 0x30c   :  { %296 = vrot.lane.b32.xlu2 %v293_v56, %s1253_s3  ;;  %v240_v59 = vsel %vm1348_vm4, %v1168_v54, %v239_v58  ;;  %v294_v0 = vmul.f32 %v293_v56, %v1358_v26 }
 0x30d   :  { %v241_v7 = vmul.f32 0.0, %v240_v59 }
 0x314   :  { %243 = vrot.lane.b32.xlu2 %v240_v59, %s1253_s3 }
 0x366   :  { %v297_v60 = vpop.permute.xlu2 %296 }
 0x367   :  { %v299_v61 = vmul.f32 %v297_v60, %v293_v56 }
 0x369   :  { %301 = vrot.lane.b32.xlu0 %v299_v61, %s1254_s21 }
 0x36e   :  { %v244_v62 = vpop.permute.xlu2 %243 }
 0x36f   :  { %v246_v63 = vmul.f32 %v244_v62, %v240_v59 }
 0x371   :  { %248 = vrot.lane.b32.xlu1 %v246_v63, %s1254_s21 }
 0x3db   :  { %v302_v3 = vpop.permute.xlu0 %301 }
 0x3dc   :  { %v1482_v4 = vadd.f32 %v302_v3, %v294_v0  ;;  %v48_v3 = vld [vmem:[%s1788_s0 + $0x18] sm:$0xff] }
 0x3dd   :  { %1118 = vmatmul.msk.f32.gmra.mxu0 %vm58_vm1, %v48_v3 }
 0x3de   :  { %1169 = vtanh.f32 %v1482_v4 }
 0x3e3   :  { %v249_v8 = vpop.permute.xlu1 %248 }
 0x3e4   :  { %v1170_v10 = vpop.eup %1169  ;;  %v1485_v11 = vadd.f32 %v249_v8, %v241_v7 }
 0x3e5   :  { %307 = vrot.lane.b32.xlu2 %v1170_v10, %s1253_s3 }
 0x3e6   :  { %1171 = vtanh.f32 %v1485_v11 }
 0x3ec   :  { %v1172_v12 = vpop.eup %1171 }
 0x3ed   :  { %254 = vrot.lane.b32.xlu0 %v1172_v12, %s1253_s3 }
 0x43f   :  { %v308_v13 = vpop.permute.xlu2 %307 }
 0x440   :  { %v310_v14 = vmul.f32 %v308_v13, %v293_v56 }
 0x442   :  { %312 = vrot.lane.b32.xlu1 %v310_v14, %s1254_s21 }
 0x45a   :  { %v113_v10 = vpop.f32.mrf.mxu0 }
 0x45f   :  { %v255_v16 = vpop.permute.xlu0 %254 }
 0x460   :  { %v1491_v17 = vmul.f32 %v255_v16, %v240_v59 }
 0x462   :  { %315 = vrot.lane.b32.xlu2 %v1491_v17, %s1253_s3 }
 0x4b4   :  { %v313_v19 = vpop.permute.xlu1 %312 }
 0x4b5   :  { %1126 = vmatmul.msk.f32.vlgmr.msrb.gmra.mxu3 %vm155_vm5, %v313_v19 }
 0x4b6   :  { %603 = vmatpush.msrb.mxu3 %v1309_v1 }
 0x4b8   :  { %604 = vmatpush.msrb.mxu3 %v1314_v2 }
 0x4ba   :  { %605 = vmatpush.msrb.mxu3 %v1323_v5 }
 0x4bc   :  { %v316_v20 = vpop.permute.xlu2 %315  ;;  %606 = vmatpush.msrb.mxu3 %v1331_v6 }
 0x4bd   :  { %v318_v21 = vsel %vm155_vm5, %v313_v19, %v316_v20 }
 0x4be   :  { %1125 = vmatmul.msk.f32.vlgmr.msrb.gmra.mxu1 %vm211_vm6, %v318_v21 }
 0x4bf   :  { %762 = vmatpush.msrb.mxu1 %v1365_v28 }
 0x4c1   :  { %763 = vmatpush.msrb.mxu1 %v1370_v29 }
 0x4c3   :  { %764 = vmatpush.msrb.mxu1 %v1377_v30 }
 0x4c5   :  { %765 = vmatpush.msrb.mxu1 %v1385_v31 }
 0x4c7   :  { %766 = vmatpush.msrb.mxu1 %v1393_v32 }
 0x4c9   :  { %767 = vmatpush.msrb.mxu1 %v1401_v33 }
 0x4cb   :  { %768 = vmatpush.msrb.mxu1 %v1409_v34 }
 0x4cd   :  { %769 = vmatpush.msrb.mxu1 %v1422_v37 }
 0x538   :  { %v392_v24 = vpop.f32.mrf.mxu3 }
 0x539   :  { %v395_v25 = vadd.f32 %v392_v24, %v111_v23 }
 0x53b   :  { %v396_v26 = vmul.f32 0.5, %v395_v25  ;;  %v339_v27 = vpop.f32.mrf.mxu1 }
 0x53c   :  { %v340_v35 = vadd.f32 %v1466_v43, %v339_v27 }
 0x53d   :  { %v397_v36 = vsel %vm1348_vm4, %v395_v25, %v396_v26 }
 0x53e   :  { %1173 = vtanh.f32 %v397_v36  ;;  %v342_v38 = vmul.f32 0.5, %v340_v35 }
 0x540   :  { %v343_v39 = vsel %vm1348_vm4, %v340_v35, %v342_v38 }
 0x541   :  { %1175 = vtanh.f32 %v343_v39 }
 0x544   :  { %v1174_v40 = vpop.eup %1173 }
 0x545   :  { %v399_v41 = vmul.f32 0.5, %v1174_v40 }
 0x547   :  { %v1176_v42 = vpop.eup %1175  ;;  %v400_v44 = vadd.f32 0.5, %v399_v41 }
 0x548   :  { %v345_v45 = vmul.f32 0.5, %v1176_v42 }
 0x549   :  { %v401_v46 = vsel %vm1348_vm4, %v1174_v40, %v400_v44 }
 0x54a   :  { %404 = vrot.lane.b32.xlu0 %v401_v46, %s1253_s3  ;;  %v346_v47 = vadd.f32 0.5, %v345_v45  ;;  %v402_v53 = vmul.f32 %v401_v46, %v1482_v4 }
 0x54c   :  { %v347_v48 = vsel %vm1348_vm4, %v1176_v42, %v346_v47  ;;  %v49_v47 = vld [vmem:[%s1788_s0 + $0x20] sm:$0xff] }
 0x54d   :  { %350 = vrot.lane.b32.xlu1 %v347_v48, %s1253_s3  ;;  %v348_v57 = vmul.f32 %v347_v48, %v1485_v11  ;;  %v114_v11 = vadd.f32 %v1345_v9, %v113_v10  ;;  %1119 = vmatmul.msk.f32.gmra.mxu0 %vm58_vm1, %v49_v47 }
 0x5bc   :  { %v405_v49 = vpop.permute.xlu0 %404 }
 0x5bd   :  { %v407_v50 = vmul.f32 %v405_v49, %v401_v46 }
 0x5bf   :  { %v351_v51 = vpop.permute.xlu1 %350  ;;  %409 = vrot.lane.b32.xlu2 %v407_v50, %s1254_s21 }
 0x5c0   :  { %v353_v52 = vmul.f32 %v351_v51, %v347_v48 }
 0x5c2   :  { %355 = vrot.lane.b32.xlu0 %v353_v52, %s1254_s21 }
 0x5ca   :  { %v116_v51 = vpop.f32.mrf.mxu0 }
 0x5cb   :  { %v117_v52 = vadd.f32 %v1345_v9, %v116_v51 }
 0x619   :  { %v410_v54 = vpop.permute.xlu2 %409 }
 0x61a   :  { %v1529_v55 = vadd.f32 %v410_v54, %v402_v53 }
 0x61c   :  { %1177 = vtanh.f32 %v1529_v55 }
 0x622   :  { %v1178_v56 = vpop.eup %1177 }
 0x623   :  { %415 = vrot.lane.b32.xlu1 %v1178_v56, %s1253_s3 }
 0x634   :  { %v356_v58 = vpop.permute.xlu0 %355 }
 0x635   :  { %v358_v59 = vadd.f32 %v356_v58, %v348_v57 }
 0x637   :  { %1179 = vtanh.f32 %v358_v59 }
 0x63d   :  { %v1180_v60 = vpop.eup %1179 }
 0x63e   :  { %361 = vrot.lane.b32.xlu2 %v1180_v60, %s1253_s3 }
 0x695   :  { %v416_v61 = vpop.permute.xlu1 %415 }
 0x696   :  { %v418_v62 = vmul.f32 %v416_v61, %v401_v46 }
 0x698   :  { %420 = vrot.lane.b32.xlu0 %v418_v62, %s1254_s21  ;;  %v362_v63 = vpop.permute.xlu2 %361 }
 0x699   :  { %v1536_v0 = vmul.f32 %v362_v63, %v347_v48 }
 0x69b   :  { %423 = vrot.lane.b32.xlu1 %v1536_v0, %s1253_s3 }
 0x70a   :  { %v421_v4 = vpop.permute.xlu0 %420 }
 0x70b   :  { %1128 = vmatmul.msk.f32.vlgmr.msra.gmra.mxu3 %vm155_vm5, %v421_v4 }
 0x70c   :  { %711 = vmatpush.msra.mxu3 %v1309_v1 }
 0x70d   :  { %v424_v7 = vpop.permute.xlu1 %423 }
 0x70e   :  { %v426_v8 = vsel %vm155_vm5, %v421_v4, %v424_v7  ;;  %712 = vmatpush.msra.mxu3 %v1314_v2 }
 0x70f   :  { %1127 = vmatmul.msk.f32.vlgmr.msrb.gmra.mxu2 %vm211_vm6, %v426_v8 }
 0x710   :  { %713 = vmatpush.msra.mxu3 %v1323_v5  ;;  %870 = vmatpush.msrb.mxu2 %v1365_v28 }
 0x712   :  { %714 = vmatpush.msra.mxu3 %v1331_v6  ;;  %871 = vmatpush.msrb.mxu2 %v1370_v29 }
 0x714   :  { %872 = vmatpush.msrb.mxu2 %v1377_v30 }
 0x716   :  { %873 = vmatpush.msrb.mxu2 %v1385_v31 }
 0x718   :  { %874 = vmatpush.msrb.mxu2 %v1393_v32 }
 0x71a   :  { %875 = vmatpush.msrb.mxu2 %v1401_v33 }
 0x71c   :  { %876 = vmatpush.msrb.mxu2 %v1409_v34 }
 0x71e   :  { %877 = vmatpush.msrb.mxu2 %v1422_v37 }
 0x78e   :  { %v500_v28 = vpop.f32.mrf.mxu3 }
 0x78f   :  { %v503_v12 = vadd.f32 %v500_v28, %v114_v11 }
 0x791   :  { %v504_v13 = vmul.f32 0.5, %v503_v12 }
 0x792   :  { %v447_v14 = vpop.f32.mrf.mxu2 }
 0x793   :  { %v505_v29 = vsel %vm1348_vm4, %v503_v12, %v504_v13  ;;  %v448_v30 = vadd.f32 %v1466_v43, %v447_v14 }
 0x794   :  { %1181 = vtanh.f32 %v505_v29 }
 0x795   :  { %v450_v31 = vmul.f32 0.5, %v448_v30 }
 0x797   :  { %v451_v32 = vsel %vm1348_vm4, %v448_v30, %v450_v31 }
 0x798   :  { %1183 = vtanh.f32 %v451_v32 }
 0x79a   :  { %v1182_v33 = vpop.eup %1181 }
 0x79b   :  { %v507_v34 = vmul.f32 0.5, %v1182_v33 }
 0x79d   :  { %v508_v37 = vadd.f32 0.5, %v507_v34 }
 0x79e   :  { %v1184_v16 = vpop.eup %1183 }
 0x79f   :  { %v509_v18 = vsel %vm1348_vm4, %v1182_v33, %v508_v37  ;;  %v453_v19 = vmul.f32 0.5, %v1184_v16 }
 0x7a0   :  { %512 = vrot.lane.b32.xlu2 %v509_v18, %s1253_s3  ;;  %v510_v26 = vmul.f32 %v509_v18, %v1529_v55 }
 0x7a1   :  { %v454_v20 = vadd.f32 0.5, %v453_v19 }
 0x7a3   :  { %v455_v21 = vsel %vm1348_vm4, %v1184_v16, %v454_v20 }
 0x7a4   :  { %458 = vrot.lane.b32.xlu0 %v455_v21, %s1253_s3  ;;  %v456_v36 = vmul.f32 %v455_v21, %v358_v59 }
 0x7fa   :  { %v513_v22 = vpop.permute.xlu2 %512 }
 0x7fb   :  { %v515_v23 = vmul.f32 %v513_v22, %v509_v18 }
 0x7fd   :  { %517 = vrot.lane.b32.xlu1 %v515_v23, %s1254_s21 }
 0x816   :  { %v459_v24 = vpop.permute.xlu0 %458 }
 0x817   :  { %v461_v25 = vmul.f32 %v459_v24, %v455_v21 }
 0x819   :  { %463 = vrot.lane.b32.xlu2 %v461_v25, %s1254_s21 }
 0x86f   :  { %v518_v27 = vpop.permute.xlu1 %517 }
 0x870   :  { %v520_v35 = vadd.f32 %v518_v27, %v510_v26 }
 0x872   :  { %1185 = vtanh.f32 %v520_v35 }
 0x873   :  { %v464_v38 = vpop.permute.xlu2 %463 }
 0x874   :  { %v466_v39 = vadd.f32 %v464_v38, %v456_v36 }
 0x876   :  { %1187 = vtanh.f32 %v466_v39 }
 0x878   :  { %v1186_v40 = vpop.eup %1185 }
 0x879   :  { %523 = vrot.lane.b32.xlu0 %v1186_v40, %s1253_s3 }
 0x87c   :  { %v1188_v41 = vpop.eup %1187 }
 0x87d   :  { %469 = vrot.lane.b32.xlu1 %v1188_v41, %s1253_s3 }
 0x8eb   :  { %v524_v42 = vpop.permute.xlu0 %523 }
 0x8ec   :  { %v526_v44 = vmul.f32 %v524_v42, %v509_v18 }
 0x8ee   :  { %528 = vrot.lane.b32.xlu2 %v526_v44, %s1254_s21 }
 0x8ef   :  { %v470_v45 = vpop.permute.xlu1 %469 }
 0x8f0   :  { %v1577_v46 = vmul.f32 %v470_v45, %v455_v21  ;;  %v50_v21 = vld [vmem:[%s1788_s0 + $0x28] sm:$0xff] }
 0x8f1   :  { %1120 = vmatmul.msk.f32.gmra.mxu0 %vm58_vm1, %v50_v21 }
 0x8f2   :  { %531 = vrot.lane.b32.xlu0 %v1577_v46, %s1253_s3 }
 0x948   :  { %v529_v48 = vpop.permute.xlu2 %528 }
 0x949   :  { %1130 = vmatmul.msk.f32.vlgmr.msrb.gmra.mxu3 %vm155_vm5, %v529_v48 }
 0x94a   :  { %819 = vmatpush.msrb.mxu3 %v1309_v1 }
 0x94c   :  { %820 = vmatpush.msrb.mxu3 %v1314_v2 }
 0x94e   :  { %821 = vmatpush.msrb.mxu3 %v1323_v5 }
 0x950   :  { %822 = vmatpush.msrb.mxu3 %v1331_v6 }
 0x964   :  { %v532_v49 = vpop.permute.xlu0 %531 }
 0x965   :  { %v534_v50 = vsel %vm155_vm5, %v529_v48, %v532_v49 }
 0x966   :  { %1129 = vmatmul.msk.f32.vlgmr.msra.gmra.mxu1 %vm211_vm6, %v534_v50 }
 0x96e   :  { %v119_v25 = vpop.f32.mrf.mxu0 }
 0x96f   :  { %v120_v26 = vadd.f32 %v1345_v9, %v119_v25 }
 0x9cc   :  { %v608_v53 = vpop.f32.mrf.mxu3 }
 0x9cd   :  { %v611_v54 = vadd.f32 %v608_v53, %v117_v52 }
 0x9cf   :  { %v612_v55 = vmul.f32 0.5, %v611_v54 }
 0x9d1   :  { %v613_v56 = vsel %vm1348_vm4, %v611_v54, %v612_v55 }
 0x9d2   :  { %1189 = vtanh.f32 %v613_v56 }
 0x9d8   :  { %v1190_v57 = vpop.eup %1189 }
 0x9d9   :  { %v615_v58 = vmul.f32 0.5, %v1190_v57 }
 0x9db   :  { %v616_v59 = vadd.f32 0.5, %v615_v58 }
 0x9dd   :  { %v617_v60 = vsel %vm1348_vm4, %v1190_v57, %v616_v59 }
 0x9de   :  { %620 = vrot.lane.b32.xlu1 %v617_v60, %s1253_s3  ;;  %v618_v30 = vmul.f32 %v617_v60, %v520_v35 }
 0x9e3   :  { %v555_v61 = vpop.f32.mrf.mxu1 }
 0x9e4   :  { %v556_v62 = vadd.f32 %v1466_v43, %v555_v61 }
 0x9e6   :  { %v558_v63 = vmul.f32 0.5, %v556_v62 }
 0x9e8   :  { %v559_v3 = vsel %vm1348_vm4, %v556_v62, %v558_v63 }
 0x9e9   :  { %1191 = vtanh.f32 %v559_v3 }
 0x9ef   :  { %v1192_v4 = vpop.eup %1191 }
 0x9f0   :  { %v561_v7 = vmul.f32 0.5, %v1192_v4 }
 0x9f2   :  { %v562_v8 = vadd.f32 0.5, %v561_v7 }
 0x9f4   :  { %v563_v10 = vsel %vm1348_vm4, %v1192_v4, %v562_v8  ;;  %v51_v4 = vld [vmem:[%s1788_s0 + $0x30] sm:$0xff] }
 0x9f5   :  { %566 = vrot.lane.b32.xlu2 %v563_v10, %s1253_s3  ;;  %v564_v14 = vmul.f32 %v563_v10, %v466_v39  ;;  %1121 = vmatmul.msk.f32.gmra.mxu0 %vm58_vm1, %v51_v4 }
 0xa4f   :  { %v567_v11 = vpop.permute.xlu2 %566 }
 0xa50   :  { %v569_v28 = vmul.f32 %v567_v11, %v563_v10  ;;  %v621_v12 = vpop.permute.xlu1 %620 }
 0xa51   :  { %v623_v13 = vmul.f32 %v621_v12, %v617_v60 }
 0xa52   :  { %571 = vrot.lane.b32.xlu1 %v569_v28, %s1254_s21 }
 0xa53   :  { %625 = vrot.lane.b32.xlu0 %v623_v13, %s1254_s21 }
 0xa72   :  { %v122_v11 = vpop.f32.mrf.mxu0 }
 0xa73   :  { %v123_v13 = vadd.f32 %v1345_v9, %v122_v11 }
 0xac4   :  { %v572_v29 = vpop.permute.xlu1 %571 }
 0xac5   :  { %v574_v31 = vadd.f32 %v572_v29, %v564_v14  ;;  %v626_v32 = vpop.permute.xlu0 %625 }
 0xac6   :  { %v628_v33 = vadd.f32 %v626_v32, %v618_v30 }
 0xac7   :  { %1193 = vtanh.f32 %v574_v31 }
 0xac8   :  { %1195 = vtanh.f32 %v628_v33 }
 0xacd   :  { %v1194_v34 = vpop.eup %1193 }
 0xace   :  { %v1196_v37 = vpop.eup %1195  ;;  %577 = vrot.lane.b32.xlu0 %v1194_v34, %s1253_s3 }
 0xacf   :  { %631 = vrot.lane.b32.xlu2 %v1196_v37, %s1253_s3 }
 0xb29   :  { %v632_v16 = vpop.permute.xlu2 %631 }
 0xb2a   :  { %v634_v18 = vmul.f32 %v632_v16, %v617_v60 }
 0xb2c   :  { %636 = vrot.lane.b32.xlu1 %v634_v18, %s1254_s21 }
 0xb40   :  { %v578_v19 = vpop.permute.xlu0 %577 }
 0xb41   :  { %v1609_v20 = vmul.f32 %v578_v19, %v563_v10 }
 0xb43   :  { %639 = vrot.lane.b32.xlu2 %v1609_v20, %s1253_s3 }
 0xb9d   :  { %v640_v22 = vpop.permute.xlu2 %639 }
 0xb9e   :  { %v637_v23 = vpop.permute.xlu1 %636 }
 0xb9f   :  { %v642_v24 = vsel %vm155_vm5, %v637_v23, %v640_v22  ;;  %1132 = vmatmul.msk.f32.vlgmr.msra.gmra.mxu3 %vm155_vm5, %v637_v23 }
 0xba0   :  { %1131 = vmatmul.msk.f32.vlgmr.msra.gmra.mxu2 %vm211_vm6, %v642_v24  ;;  %927 = vmatpush.msra.mxu3 %v1309_v1 }
 0xba2   :  { %928 = vmatpush.msra.mxu3 %v1314_v2 }
 0xba4   :  { %929 = vmatpush.msra.mxu3 %v1323_v5 }
 0xba6   :  { %930 = vmatpush.msra.mxu3 %v1331_v6 }
 0xc22   :  { %v716_v27 = vpop.f32.mrf.mxu3 }
 0xc23   :  { %v719_v35 = vadd.f32 %v716_v27, %v120_v26  ;;  %v663_v36 = vpop.f32.mrf.mxu2 }
 0xc24   :  { %v664_v38 = vadd.f32 %v1466_v43, %v663_v36 }
 0xc25   :  { %v720_v39 = vmul.f32 0.5, %v719_v35 }
 0xc26   :  { %v666_v40 = vmul.f32 0.5, %v664_v38 }
 0xc27   :  { %v721_v41 = vsel %vm1348_vm4, %v719_v35, %v720_v39 }
 0xc28   :  { %1197 = vtanh.f32 %v721_v41  ;;  %v667_v1 = vsel %vm1348_vm4, %v664_v38, %v666_v40 }
 0xc29   :  { %1199 = vtanh.f32 %v667_v1 }
 0xc2e   :  { %v1198_v2 = vpop.eup %1197 }
 0xc2f   :  { %v1200_v5 = vpop.eup %1199  ;;  %v723_v6 = vmul.f32 0.5, %v1198_v2 }
 0xc30   :  { %v669_v42 = vmul.f32 0.5, %v1200_v5 }
 0xc31   :  { %v724_v44 = vadd.f32 0.5, %v723_v6 }
 0xc32   :  { %v670_v45 = vadd.f32 0.5, %v669_v42 }
 0xc33   :  { %v725_v47 = vsel %vm1348_vm4, %v1198_v2, %v724_v44 }
 0xc34   :  { %728 = vrot.lane.b32.xlu0 %v725_v47, %s1253_s3  ;;  %v671_v48 = vsel %vm1348_vm4, %v1200_v5, %v670_v45  ;;  %v726_v53 = vmul.f32 %v725_v47, %v628_v33  ;;  %v52_v45 = vld [vmem:[%s1788_s0 + $0x38] sm:$0xff] }
 0xc35   :  { %674 = vrot.lane.b32.xlu1 %v671_v48, %s1253_s3  ;;  %v672_v57 = vmul.f32 %v671_v48, %v574_v31  ;;  %1122 = vmatmul.msk.f32.gmra.mxu0 %vm58_vm1, %v52_v45 }
 0xca6   :  { %v729_v49 = vpop.permute.xlu0 %728 }
 0xca7   :  { %v731_v50 = vmul.f32 %v729_v49, %v725_v47  ;;  %v675_v51 = vpop.permute.xlu1 %674 }
 0xca8   :  { %v677_v52 = vmul.f32 %v675_v51, %v671_v48 }
 0xca9   :  { %733 = vrot.lane.b32.xlu2 %v731_v50, %s1254_s21 }
 0xcaa   :  { %679 = vrot.lane.b32.xlu0 %v677_v52, %s1254_s21 }
 0xcb2   :  { %v125_v50 = vpop.f32.mrf.mxu0 }
 0xcb3   :  { %v126_v51 = vadd.f32 %v1345_v9, %v125_v50 }
 0xd03   :  { %v734_v54 = vpop.permute.xlu2 %733 }
 0xd04   :  { %v736_v55 = vadd.f32 %v734_v54, %v726_v53 }
 0xd06   :  { %1201 = vtanh.f32 %v736_v55 }
 0xd0c   :  { %v1202_v56 = vpop.eup %1201 }
 0xd0d   :  { %739 = vrot.lane.b32.xlu1 %v1202_v56, %s1253_s3 }
 0xd1c   :  { %v680_v58 = vpop.permute.xlu0 %679 }
 0xd1d   :  { %v682_v59 = vadd.f32 %v680_v58, %v672_v57 }
 0xd1f   :  { %1203 = vtanh.f32 %v682_v59 }
 0xd25   :  { %v1204_v60 = vpop.eup %1203 }
 0xd26   :  { %685 = vrot.lane.b32.xlu2 %v1204_v60, %s1253_s3 }
 0xd7f   :  { %v740_v61 = vpop.permute.xlu1 %739 }
 0xd80   :  { %v742_v62 = vmul.f32 %v740_v61, %v725_v47  ;;  %v686_v63 = vpop.permute.xlu2 %685 }
 0xd81   :  { %v1640_v3 = vmul.f32 %v686_v63, %v671_v48 }
 0xd82   :  { %744 = vrot.lane.b32.xlu0 %v742_v62, %s1254_s21 }
 0xd83   :  { %747 = vrot.lane.b32.xlu1 %v1640_v3, %s1253_s3 }
 0xdf4   :  { %v745_v7 = vpop.permute.xlu0 %744 }
 0xdf5   :  { %1134 = vmatmul.msk.f32.vlgmr.msrb.gmra.mxu3 %vm155_vm5, %v745_v7  ;;  %v748_v8 = vpop.permute.xlu1 %747 }
 0xdf6   :  { %v750_v10 = vsel %vm155_vm5, %v745_v7, %v748_v8 }
 0xdf7   :  { %1133 = vmatmul.msk.f32.vlgmr.msrb.gmra.mxu1 %vm211_vm6, %v750_v10 }
 0xe74   :  { %v771_v28 = vpop.f32.mrf.mxu1 }
 0xe75   :  { %v772_v12 = vadd.f32 %v1466_v43, %v771_v28 }
 0xe77   :  { %v774_v14 = vmul.f32 0.5, %v772_v12 }
 0xe78   :  { %v824_v29 = vpop.f32.mrf.mxu3 }
 0xe79   :  { %v775_v30 = vsel %vm1348_vm4, %v772_v12, %v774_v14  ;;  %v827_v31 = vadd.f32 %v824_v29, %v123_v13 }
 0xe7a   :  { %1205 = vtanh.f32 %v775_v30 }
 0xe7b   :  { %v828_v32 = vmul.f32 0.5, %v827_v31 }
 0xe7d   :  { %v829_v33 = vsel %vm1348_vm4, %v827_v31, %v828_v32 }
 0xe7e   :  { %1207 = vtanh.f32 %v829_v33 }
 0xe80   :  { %v1206_v34 = vpop.eup %1205 }
 0xe81   :  { %v777_v37 = vmul.f32 0.5, %v1206_v34 }
 0xe83   :  { %v778_v16 = vadd.f32 0.5, %v777_v37 }
 0xe84   :  { %v1208_v18 = vpop.eup %1207 }
 0xe85   :  { %v779_v19 = vsel %vm1348_vm4, %v1206_v34, %v778_v16  ;;  %v831_v21 = vmul.f32 0.5, %v1208_v18 }
 0xe86   :  { %782 = vrot.lane.b32.xlu2 %v779_v19, %s1253_s3  ;;  %v780_v35 = vmul.f32 %v779_v19, %v682_v59 }
 0xe87   :  { %v832_v22 = vadd.f32 0.5, %v831_v21 }
 0xe89   :  { %v833_v23 = vsel %vm1348_vm4, %v1208_v18, %v832_v22 }
 0xe8a   :  { %836 = vrot.lane.b32.xlu0 %v833_v23, %s1253_s3  ;;  %v834_v39 = vmul.f32 %v833_v23, %v736_v55 }
 0xee0   :  { %v783_v24 = vpop.permute.xlu2 %782 }
 0xee1   :  { %v785_v25 = vmul.f32 %v783_v24, %v779_v19 }
 0xee3   :  { %787 = vrot.lane.b32.xlu1 %v785_v25, %s1254_s21 }
 0xefc   :  { %v837_v26 = vpop.permute.xlu0 %836 }
 0xefd   :  { %v839_v27 = vmul.f32 %v837_v26, %v833_v23 }
 0xeff   :  { %841 = vrot.lane.b32.xlu2 %v839_v27, %s1254_s21 }
 0xf55   :  { %v788_v36 = vpop.permute.xlu1 %787 }
 0xf56   :  { %v790_v38 = vadd.f32 %v788_v36, %v780_v35 }
 0xf58   :  { %1209 = vtanh.f32 %v790_v38 }
 0xf59   :  { %v842_v40 = vpop.permute.xlu2 %841 }
 0xf5a   :  { %v844_v41 = vadd.f32 %v842_v40, %v834_v39  ;;  %v1028_v40 = vld [vmem:[%s1794_s6 + $0x8] sm:$0xff] }
 0xf5c   :  { %1211 = vtanh.f32 %v844_v41 }
 0xf5e   :  { %v1210_v1 = vpop.eup %1209 }
 0xf5f   :  { %793 = vrot.lane.b32.xlu0 %v1210_v1, %s1253_s3 }
 0xf62   :  { %v1212_v2 = vpop.eup %1211 }
 0xf63   :  { %847 = vrot.lane.b32.xlu1 %v1212_v2, %s1253_s3 }
 0xfd1   :  { %v794_v5 = vpop.permute.xlu0 %793 }
 0xfd2   :  { %v1668_v6 = vmul.f32 %v794_v5, %v779_v19 }
 0xfd4   :  { %855 = vrot.lane.b32.xlu0 %v1668_v6, %s1253_s3 }
 0xfd5   :  { %v848_v42 = vpop.permute.xlu1 %847 }
 0xfd6   :  { %v850_v44 = vmul.f32 %v848_v42, %v833_v23 }
 0xfd8   :  { %852 = vrot.lane.b32.xlu2 %v850_v44, %s1254_s21 }
0x1032   :  { %v853_v47 = vpop.permute.xlu2 %852 }
0x1033   :  { %1136 = vmatmul.msk.f32.vlgmr.msra.gmra.mxu3 %vm155_vm5, %v853_v47 }
0x1046   :  { %v856_v48 = vpop.permute.xlu0 %855 }
0x1047   :  { %v858_v49 = vsel %vm155_vm5, %v853_v47, %v856_v48 }
0x1048   :  { %1135 = vmatmul.msk.f32.vlgmr.msrb.gmra.mxu2 %vm211_vm6, %v858_v49 }
0x10b6   :  { %v932_v52 = vpop.f32.mrf.mxu3 }
0x10b7   :  { %v935_v53 = vadd.f32 %v932_v52, %v126_v51  ;;  %v1160_v52 = vld [vmem:[#allocation4] ss:$0 sm:$0xff] }
0x10b9   :  { %v936_v54 = vmul.f32 0.5, %v935_v53 }
0x10bb   :  { %v937_v55 = vsel %vm1348_vm4, %v935_v53, %v936_v54 }
0x10bc   :  { %1213 = vtanh.f32 %v937_v55 }
0x10c2   :  { %v1214_v56 = vpop.eup %1213 }
0x10c3   :  { %v939_v57 = vmul.f32 0.5, %v1214_v56 }
0x10c5   :  { %v940_v58 = vadd.f32 0.5, %v939_v57 }
0x10c7   :  { %v941_v59 = vsel %vm1348_vm4, %v1214_v56, %v940_v58 }
0x10c8   :  { %944 = vrot.lane.b32.xlu2 %v941_v59, %s1253_s3  ;;  %v942_v13 = vmul.f32 %v941_v59, %v844_v41  ;;  %v1027_v41 = vld [vmem:[%s1794_s6] sm:$0xff] }
0x10cb   :  { %v879_v60 = vpop.f32.mrf.mxu2 }
0x10cc   :  { %v880_v61 = vadd.f32 %v1466_v43, %v879_v60 }
0x10ce   :  { %v882_v62 = vmul.f32 0.5, %v880_v61 }
0x10d0   :  { %v883_v9 = vsel %vm1348_vm4, %v880_v61, %v882_v62 }
0x10d1   :  { %1215 = vtanh.f32 %v883_v9 }
0x10d7   :  { %v1216_v63 = vpop.eup %1215 }
0x10d8   :  { %v885_v4 = vmul.f32 0.5, %v1216_v63 }
0x10da   :  { %v886_v7 = vadd.f32 0.5, %v885_v4 }
0x10dc   :  { %v887_v8 = vsel %vm1348_vm4, %v1216_v63, %v886_v7 }
0x10dd   :  { %890 = vrot.lane.b32.xlu1 %v887_v8, %s1253_s3  ;;  %v888_v31 = vmul.f32 %v887_v8, %v790_v38 }
0x1122   :  { %v945_v10 = vpop.permute.xlu2 %944 }
0x1123   :  { %v947_v11 = vmul.f32 %v945_v10, %v941_v59 }
0x1125   :  { %949 = vrot.lane.b32.xlu1 %v947_v11, %s1254_s21 }
0x114f   :  { %v891_v28 = vpop.permute.xlu1 %890 }
0x1150   :  { %v893_v12 = vmul.f32 %v891_v28, %v887_v8 }
0x1152   :  { %895 = vrot.lane.b32.xlu0 %v893_v12, %s1254_s21 }
0x1197   :  { %v950_v14 = vpop.permute.xlu1 %949 }
0x1198   :  { %v952_v29 = vadd.f32 %v950_v14, %v942_v13 }
0x119a   :  { %1217 = vtanh.f32 %v952_v29 }
0x11a0   :  { %v1218_v30 = vpop.eup %1217 }
0x11a1   :  { %955 = vrot.lane.b32.xlu0 %v1218_v30, %s1253_s3 }
0x11c4   :  { %v896_v32 = vpop.permute.xlu0 %895 }
0x11c5   :  { %v898_v33 = vadd.f32 %v896_v32, %v888_v31 }
0x11c7   :  { %1219 = vtanh.f32 %v898_v33 }
0x11cd   :  { %v1220_v34 = vpop.eup %1219 }
0x11ce   :  { %901 = vrot.lane.b32.xlu2 %v1220_v34, %s1253_s3 }
0x1213   :  { %v956_v37 = vpop.permute.xlu0 %955 }
0x1214   :  { %v958_v16 = vmul.f32 %v956_v37, %v941_v59 }
0x1216   :  { %960 = vrot.lane.b32.xlu1 %v958_v16, %s1254_s21 }
0x1228   :  { %v902_v18 = vpop.permute.xlu2 %901 }
0x1229   :  { %v904_v19 = vmul.f32 %v902_v18, %v887_v8 }
0x122b   :  { %963 = vrot.lane.b32.xlu2 %v904_v19, %s1253_s3 }
0x1285   :  { %v964_v21 = vpop.permute.xlu2 %963 }
0x1288   :  { %v961_v22 = vpop.permute.xlu1 %960 }
0x1289   :  { %v966_v23 = vsel %vm155_vm5, %v961_v22, %v964_v21 }
0x128a   :  { %1137 = vmatmul.msk.f32.vlgmr.msrb.gmra.mxu0 %vm211_vm6, %v966_v23 }
0x1307   :  { %v987_v24 = vpop.f32.mrf.mxu0 }
0x1308   :  { %v988_v25 = vadd.f32 %v1466_v43, %v987_v24  ;;  %v1030_v43 = vld [vmem:[%s1794_s6 + $0x18] sm:$0xff] }
0x1309   :  { %1147 = vmatpush.msrb.mxu3 %v1030_v43  ;;  %1071 = vmatpush.msra.mxu1 %v1030_v43 }
0x130a   :  { %v990_v26 = vmul.f32 0.5, %v988_v25  ;;  %1146 = vmatpush.msra.mxu2 %v1030_v43 }
0x130b   :  { %1149 = vmatpush.msrb.mxu3 %v1029_v15  ;;  %1072 = vmatpush.msra.mxu1 %v1029_v15 }
0x130c   :  { %v991_v27 = vsel %vm1348_vm4, %v988_v25, %v990_v26  ;;  %1148 = vmatpush.msra.mxu2 %v1029_v15 }
0x130d   :  { %1221 = vtanh.f32 %v991_v27  ;;  %1151 = vmatpush.msrb.mxu3 %v1028_v40  ;;  %1073 = vmatpush.msra.mxu1 %v1028_v40 }
0x130e   :  { %1150 = vmatpush.msra.mxu2 %v1028_v40 }
0x130f   :  { %1153 = vmatpush.msrb.mxu3 %v1027_v41  ;;  %1074 = vmatpush.msra.mxu1 %v1027_v41 }
0x1310   :  { %1152 = vmatpush.msra.mxu2 %v1027_v41 }
0x1313   :  { %v1222_v35 = vpop.eup %1221 }
0x1314   :  { %v993_v36 = vmul.f32 0.5, %v1222_v35 }
0x1316   :  { %v994_v38 = vadd.f32 0.5, %v993_v36 }
0x1318   :  { %v1705_v39 = vsel %vm1348_vm4, %v1222_v35, %v994_v38 }
0x1319   :  { %998 = vrot.lane.b32.xlu0 %v1705_v39, %s1253_s3  ;;  %v996_v45 = vmul.f32 %v1705_v39, %v898_v33 }
0x1321   :  { %798 = vrot.lane.b32.xlu0 %v1668_v6, %s1254_s21 }
0x1329   :  { %906 = vrot.lane.b32.xlu0 %v904_v19, %s1254_s21 }
0x138b   :  { %v999_v1 = vpop.permute.xlu0 %998 }
0x138c   :  { %v1001_v2 = vmul.f32 %v999_v1, %v1705_v39 }
0x138e   :  { %1003 = vrot.lane.b32.xlu1 %v1001_v2, %s1254_s21 }
0x1393   :  { %v799_v5 = vpop.permute.xlu0 %798 }
0x1394   :  { %802 = vst.msk [vmem:[#allocation3 + $0x28] sm:$0xff] %vm155_vm5, %v799_v5 }
0x1396   :  { %259 = vrot.lane.b32.xlu1 %v1491_v17, %s1254_s21 }
0x139b   :  { %v907_v6 = vpop.permute.xlu0 %906  ;;  %v1024_v42 = vld [vmem:[#allocation3 + $0x28] sm:$0xff] }
0x139c   :  { %910 = vst.msk [vmem:[#allocation3 + $0x30] sm:$0xff] %vm155_vm5, %v907_v6  ;;  %1143 = vmatmul.msk.f32.vlgmr.msrb.gmra.mxu3 %vm155_vm5, %v1024_v42 }
0x139e   :  { %366 = vrot.lane.b32.xlu1 %v1536_v0, %s1254_s21 }
0x13a3   :  { %v1025_v44 = vld [vmem:[#allocation3 + $0x30] sm:$0xff] }
0x13a4   :  { %1144 = vmatmul.msk.f32.gmra.mxu3 %vm155_vm5, %v1025_v44 }
0x13a6   :  { %474 = vrot.lane.b32.xlu1 %v1577_v46, %s1254_s21 }
0x1400   :  { %v1004_v47 = vpop.permute.xlu1 %1003 }
0x1401   :  { %v1006_v48 = vadd.f32 %v1004_v47, %v996_v45 }
0x1403   :  { %1223 = vtanh.f32 %v1006_v48 }
0x1408   :  { %v260_v17 = vpop.permute.xlu1 %259 }
0x1409   :  { %v1224_v49 = vpop.eup %1223  ;;  %262 = vst.msk [vmem:[#allocation3] sm:$0xff] %vm155_vm5, %v260_v17 }
0x140a   :  { %1009 = vrot.lane.b32.xlu2 %v1224_v49, %s1253_s3 }
0x1410   :  { %v367_v50 = vpop.permute.xlu1 %366  ;;  %v1019_v51 = vld [vmem:[#allocation3] sm:$0xff] }
0x1411   :  { %370 = vst.msk [vmem:[#allocation3 + $0x8] sm:$0xff] %vm155_vm5, %v367_v50  ;;  %1138 = vmatmul.msk.f32.vlgmr.msra.gmra.mxu1 %vm155_vm5, %v1019_v51 }
0x1412   :  { %582 = vrot.lane.b32.xlu2 %v1609_v20, %s1254_s21 }
0x1418   :  { %v475_v0 = vpop.permute.xlu1 %474  ;;  %v1020_v46 = vld [vmem:[#allocation3 + $0x8] sm:$0xff] }
0x1419   :  { %478 = vst.msk [vmem:[#allocation3 + $0x10] sm:$0xff] %vm155_vm5, %v475_v0  ;;  %1139 = vmatmul.msk.f32.gmra.mxu1 %vm155_vm5, %v1020_v46 }
0x141a   :  { %690 = vrot.lane.b32.xlu2 %v1640_v3, %s1254_s21 }
0x141f   :  { %v1091_v53 = vpop.f32.mrf.mxu3 }
0x1420   :  { %v1092_v54 = vadd.f32 %v1160_v52, %v1091_v53  ;;  %v1021_v55 = vld [vmem:[#allocation3 + $0x10] sm:$0xff] }
0x1421   :  { %1140 = vmatmul.msk.f32.gmra.mxu1 %vm155_vm5, %v1021_v55 }
0x1422   :  { %1106 = vst.msk [vmem:[%s1796_s8 + $0x28] sm:$0xff] %vm1100_vm7, %v1092_v54 }
0x1427   :  { %v1094_v20 = vpop.f32.mrf.mxu3 }
0x1428   :  { %v1095_v56 = vadd.f32 %v1160_v52, %v1094_v20 }
0x142a   :  { %1107 = vst.msk [vmem:[%s1796_s8 + $0x30] sm:$0xff] %vm1100_vm7, %v1095_v56 }
0x1464   :  { %v1010_v3 = vpop.permute.xlu2 %1009 }
0x1465   :  { %v1012_v57 = vmul.f32 %v1010_v3, %v1705_v39 }
0x1467   :  { %1014 = vrot.lane.b32.xlu0 %v1012_v57, %s1254_s21 }
0x146c   :  { %v583_v58 = vpop.permute.xlu2 %582 }
0x146d   :  { %586 = vst.msk [vmem:[#allocation3 + $0x18] sm:$0xff] %vm155_vm5, %v583_v58 }
0x1474   :  { %v691_v59 = vpop.permute.xlu2 %690  ;;  %v1022_v60 = vld [vmem:[#allocation3 + $0x18] sm:$0xff] }
0x1475   :  { %694 = vst.msk [vmem:[#allocation3 + $0x20] sm:$0xff] %vm155_vm5, %v691_v59  ;;  %1141 = vmatmul.msk.f32.vlgmr.msra.gmra.mxu2 %vm155_vm5, %v1022_v60 }
0x147c   :  { %v1023_v61 = vld [vmem:[#allocation3 + $0x20] sm:$0xff] }
0x147d   :  { %1142 = vmatmul.msk.f32.gmra.mxu2 %vm155_vm5, %v1023_v61 }
0x148e   :  { %v1076_v62 = vpop.f32.mrf.mxu1 }
0x148f   :  { %v1077_v9 = vadd.f32 %v1160_v52, %v1076_v62 }
0x1491   :  { %1101 = vst.msk [vmem:[%s1796_s8] sm:$0xff] %vm1100_vm7, %v1077_v9 }
0x1496   :  { %v1079_v63 = vpop.f32.mrf.mxu1 }
0x1497   :  { %v1080_v4 = vadd.f32 %v1160_v52, %v1079_v63 }
0x1499   :  { %1102 = vst.msk [vmem:[%s1796_s8 + $0x8] sm:$0xff] %vm1100_vm7, %v1080_v4 }
0x149e   :  { %v1082_v7 = vpop.f32.mrf.mxu1 }
0x149f   :  { %v1083_v8 = vadd.f32 %v1160_v52, %v1082_v7 }
0x14a1   :  { %1103 = vst.msk [vmem:[%s1796_s8 + $0x10] sm:$0xff] %vm1100_vm7, %v1083_v8 }
0x14d9   :  { %v1015_v10 = vpop.permute.xlu0 %1014 }
0x14da   :  { %1018 = vst.msk [vmem:[#allocation3 + $0x38] sm:$0xff] %vm155_vm5, %v1015_v10 }
0x14e1   :  { %v1026_v11 = vld [vmem:[#allocation3 + $0x38] sm:$0xff] }
0x14e2   :  { %1145 = vmatmul.msk.f32.gmra.mxu3 %vm155_vm5, %v1026_v11 }
0x14f8   :  { %v1085_v28 = vpop.f32.mrf.mxu2 }
0x14f9   :  { %v1086_v12 = vadd.f32 %v1160_v52, %v1085_v28 }
0x14fb   :  { %1104 = vst.msk [vmem:[%s1796_s8 + $0x18] sm:$0xff] %vm1100_vm7, %v1086_v12 }
0x1500   :  { %v1088_v13 = vpop.f32.mrf.mxu2 }
0x1501   :  { %v1089_v14 = vadd.f32 %v1160_v52, %v1088_v13 }
0x1503   :  { %1105 = vst.msk [vmem:[%s1796_s8 + $0x20] sm:$0xff] %vm1100_vm7, %v1089_v14 }
0x1565   :  { %v1097_v29 = vpop.f32.mrf.mxu3 }
0x1566   :  { %v1098_v30 = vadd.f32 %v1160_v52, %v1097_v29 }
0x1568   :  { %1108 = vst.msk [vmem:[%s1796_s8 + $0x38] sm:$0xff] %vm1100_vm7, %v1098_v30 }
0x1569   :  { %1113 = vsyncpa [#allocation6], 1 }

</bundles_post_ra>
